<compile_context>
chip_gen: v7x
topology: tpu7x:2x2x1
jax: 0.10.0
libtpu: 0.0.40
codegen_flags: <defaults>
</compile_context>

<pallas_src>
import functools
import math

import jax
import jax.numpy as jnp
from jax.experimental import pallas as pl
from jax.experimental.pallas import tpu as pltpu


# --------------------------------------------------------------------------- #
# Kernel
# --------------------------------------------------------------------------- #
def _hier_attn_kernel(hcol_ref, v_ref, vt_ref, u_ref, wab_ref, wc_ref, bias_ref,
                      out_ref, a_ref, aux_s, m_s, l_s, acc_s):
    """Fused attention + Wa/Wb + causal convs + sigmoid gate.

    Grid = (batch blocks ["parallel"], N blocks ["arbitrary"]).
    Everything is time-major with the batch block folded into the row (sublane)
    dimension, so each shared-weight projection is one big matmul (M = Bb*T)
    and the flash accumulators convert to/from batched form with cheap reshapes.
    """
    f32 = jnp.float32
    n = pl.program_id(1)
    num_n = pl.num_programs(1)
    Bb, T, Dc = acc_s.shape
    Lb = Bb * T
    De = wab_ref.shape[1] // 2
    mxu_dt = u_ref.dtype

    @pl.when(n == 0)
    def _init():
        # The unshifted tap (k = K-1) occupies the first De columns of the
        # im2col block, so h is only DMA'd once.
        h_tm = hcol_ref[:, :De]                                        # (Lb, De)
        aux = jnp.dot(h_tm, u_ref[...], preferred_element_type=f32)    # (Lb, Dc)
        aux_s[...] = aux.reshape(Bb, T, Dc).astype(mxu_dt)
        m_s[...] = jnp.full(m_s.shape, -jnp.inf, m_s.dtype)
        l_s[...] = jnp.zeros(l_s.shape, l_s.dtype)
        acc_s[...] = jnp.zeros(acc_s.shape, acc_s.dtype)

    # ---------------- flash-style online softmax over the N axis -------------
    # scores: (Bb,T,Dc) x (Bb,Dc,Nb) -> (Bb,T,Nb)  (per-batch v => batched matmul)
    s = jax.lax.dot_general(aux_s[...], v_ref[...],
                            (((2,), (1,)), ((0,), (0,))),
                            preferred_element_type=f32)
    m_prev = m_s[...]
    m_new = jnp.maximum(m_prev, jnp.max(s, axis=-1, keepdims=True))
    alpha = jnp.exp(m_prev - m_new)
    p = jnp.exp(s - m_new)
    l_s[...] = alpha * l_s[...] + jnp.sum(p, axis=-1, keepdims=True)
    # readout: (Bb,T,Nb) x (Bb,Nb,Dc) -> (Bb,T,Dc); using the (N, Dc) copy of v
    # avoids a lane-vs-lane contraction (no implicit transpose).
    pv = jax.lax.dot_general(p.astype(mxu_dt), vt_ref[...],
                             (((2,), (1,)), ((0,), (0,))),
                             preferred_element_type=f32)
    acc_s[...] = alpha * acc_s[...] + pv
    m_s[...] = m_new

    @pl.when(n == num_n - 1)
    def _finalize():
        inv_l = pl.reciprocal(l_s[...], approx=True)                   # EUP
        a_t = (acc_s[...] * inv_l).reshape(Lb, Dc)                     # (Lb, Dc) f32
        a_ref[...] = a_t.astype(a_ref.dtype)
        # Stacked [Wa;Wb] projection and stacked causal-conv taps: 2 big matmuls.
        proj = jnp.dot(a_t.astype(mxu_dt), wab_ref[...],
                       preferred_element_type=f32)                     # (Lb, 2De)
        conv = jnp.dot(hcol_ref[...], wc_ref[...],
                       preferred_element_type=f32)                     # (Lb, 2De)
        tot = proj + conv + bias_ref[...]
        h_a = tot[:, :De]
        h_b = tot[:, De:]
        gate = pl.reciprocal(1.0 + jnp.exp(-h_b), approx=True)         # sigmoid (EUP)
        out_ref[...] = (h_a * gate).astype(out_ref.dtype)


# --------------------------------------------------------------------------- #
# Chip-aware heuristics
# --------------------------------------------------------------------------- #
def _chip_info():
    """Returns (vmem_capacity_bytes, multi_tensorcore_chip)."""
    vmem_cap = 128 * 1024 * 1024
    multi_tc = False
    try:
        info = pltpu.get_tpu_info()
        cap = getattr(info, "vmem_capacity_bytes", None)
        if cap:
            vmem_cap = int(cap)
    except Exception:
        pass
    try:
        kind = jax.devices()[0].device_kind.lower()
        # v4 / v5p megacore and v7x have 2 TensorCores worth of "parallel" work.
        multi_tc = ("v7" in kind or "v4" in kind
                    or ("v5" in kind and "lite" not in kind and "5e" not in kind))
    except Exception:
        pass
    return vmem_cap, multi_tc


def _pick_n_block(N, max_nb=256):
    """Largest multiple-of-128 divisor of N (<= max_nb), else the full N."""
    if N % 128 == 0:
        for cand in range(min(max_nb, N), 0, -128):
            if N % cand == 0:
                return cand
    return N


def _pick_batch_block(B, T, De, Dc, Nb, K, multi_tc, budget, mxu_isz, out_isz):
    """Largest batch block whose VMEM footprint fits `budget`.

    Accounting includes double-buffered input/output blocks, the f32 softmax
    intermediates (s, p) and the flash scratch (review item on v7x's 64 MiB).
    """
    g = 8 // math.gcd(T, 8)          # smallest Bb with (Bb*T) % 8 == 0

    def est(bb):
        lb = bb * T
        by = 0
        by += 2 * lb * K * De * mxu_isz           # im2col block (double-buffered)
        by += 2 * 2 * bb * Dc * Nb * mxu_isz      # v and v_t blocks
        by += 2 * lb * (De + Dc) * out_isz        # out + a blocks
        by += lb * Dc * (mxu_isz + 4)             # aux + f32 acc scratch
        by += 2 * lb * 128 * 4                    # m / l scratch (lane padded)
        by += 3 * lb * Nb * 4                     # s, p (+slack) f32 intermediates
        by += 2 * lb * Dc * 4                     # pv / rescale temps
        by += 3 * lb * 2 * De * 4                 # proj, conv, tot
        return by

    b_cap = ((B + g - 1) // g) * g
    bb = g
    while bb + g <= b_cap and est(bb + g) <= budget:
        bb += g
    # Multi-TC chips only: keep >=2 "parallel" grid steps so both cores get work.
    if multi_tc and b_cap >= 2 * g and -(-B // bb) < 2:
        bb = max(g, (b_cap // (2 * g)) * g)
    return bb


# --------------------------------------------------------------------------- #
# Wrapper
# --------------------------------------------------------------------------- #
def _hierarchical_attention_forward(h, v, U, wa_w, wa_b, wb_w, wb_b,
                                    ca_w, ca_b, cb_w, cb_b, *,
                                    batch_block=None, n_block=None,
                                    mxu_dtype=jnp.bfloat16):
    B, De, T = h.shape
    Dc = v.shape[1]
    N = v.shape[2] * v.shape[3]
    K = ca_w.shape[2]
    out_dtype = h.dtype
    md = jnp.dtype(mxu_dtype)

    # ---- N blocking (flash axis) ----
    if n_block is not None and N % int(n_block) == 0 and \
            (int(n_block) == N or int(n_block) % 128 == 0):
        Nb = int(n_block)
    else:
        Nb = _pick_n_block(N)

    # ---- chip-aware batch blocking ----
    vmem_cap, multi_tc = _chip_info()
    vmem_limit = int(min(vmem_cap // 2, 100 * 1024 * 1024))
    budget = int(vmem_limit * 0.7)
    g = 8 // math.gcd(T, 8)
    if batch_block is not None:
        Bb = max(1, int(batch_block))
    else:
        Bb = _pick_batch_block(B, T, De, Dc, Nb, K, multi_tc, budget,
                               md.itemsize, jnp.dtype(out_dtype).itemsize)
    if -(-B // Bb) > 1 and (Bb * T) % 8 != 0:
        Bb = -(-Bb // g) * g          # keep (Bb*T, ...) blocks (8, x)-legal
    n_bblocks = -(-B // Bb)           # pad the batch instead of divisor-hunting
    Bp = n_bblocks * Bb

    if Bp != B:
        h = jnp.pad(h, ((0, Bp - B), (0, 0), (0, 0)))
        v4 = jnp.pad(v, ((0, Bp - B), (0, 0), (0, 0), (0, 0)))
    else:
        v4 = v

    # ---- wrapper-side layout plumbing (kernel stays transpose-free) ----
    v_flat = v4.reshape(Bp, Dc, N).astype(md)              # (Bp, Dc, N)
    v_t = jnp.transpose(v_flat, (0, 2, 1))                 # (Bp, N, Dc)

    # Causal im2col, time-major, batch folded into rows.  Tap j=0 is unshifted h.
    hpad = jnp.pad(h, ((0, 0), (0, 0), (K - 1, 0)))        # (Bp, De, T+K-1)
    taps = [hpad[:, :, (K - 1 - j):(K - 1 - j) + T] for j in range(K)]
    hcol = jnp.concatenate(taps, axis=1)                   # (Bp, K*De, T)
    hcol_tm = jnp.transpose(hcol, (0, 2, 1)).reshape(Bp * T, K * De).astype(md)

    U_m = U.astype(md)                                     # (De, Dc)
    wab = jnp.concatenate([wa_w, wb_w], axis=0).T.astype(md)            # (Dc, 2De)
    wc_a = jnp.concatenate([ca_w[:, :, K - 1 - j].T for j in range(K)], axis=0)
    wc_b = jnp.concatenate([cb_w[:, :, K - 1 - j].T for j in range(K)], axis=0)
    wc = jnp.concatenate([wc_a, wc_b], axis=1).astype(md)               # (K*De, 2De)
    bias = jnp.concatenate([wa_b + ca_b, wb_b + cb_b]).reshape(1, 2 * De)
    bias = bias.astype(jnp.float32)

    Lb = Bb * T
    grid = (n_bblocks, N // Nb)

    in_specs = [
        pl.BlockSpec((Lb, K * De), lambda i, n: (i, 0)),       # im2col'd h
        pl.BlockSpec((Bb, Dc, Nb), lambda i, n: (i, 0, n)),    # v   (Dc, N)
        pl.BlockSpec((Bb, Nb, Dc), lambda i, n: (i, n, 0)),    # v^T (N, Dc)
        pl.BlockSpec((De, Dc), lambda i, n: (0, 0)),           # U
        pl.BlockSpec((Dc, 2 * De), lambda i, n: (0, 0)),       # [Wa;Wb]^T
        pl.BlockSpec((K * De, 2 * De), lambda i, n: (0, 0)),   # stacked conv taps
        pl.BlockSpec((1, 2 * De), lambda i, n: (0, 0)),        # combined biases
    ]
    out_specs = [
        pl.BlockSpec((Lb, De), lambda i, n: (i, 0)),           # gated output slab
        pl.BlockSpec((Lb, Dc), lambda i, n: (i, 0)),           # attention readout slab
    ]
    out_shape = (jax.ShapeDtypeStruct((Bp * T, De), out_dtype),
                 jax.ShapeDtypeStruct((Bp * T, Dc), out_dtype))
    scratch_shapes = [
        pltpu.VMEM((Bb, T, Dc), md),            # aux (cached across N steps)
        pltpu.VMEM((Bb, T, 1), jnp.float32),    # m (running max)
        pltpu.VMEM((Bb, T, 1), jnp.float32),    # l (running denom)
        pltpu.VMEM((Bb, T, Dc), jnp.float32),   # acc (running readout)
    ]

    out_flat, a_flat = pl.pallas_call(
        _hier_attn_kernel,
        out_shape=out_shape,
        grid_spec=pltpu.PrefetchScalarGridSpec(
            num_scalar_prefetch=0,
            grid=grid,
            in_specs=in_specs,
            out_specs=out_specs,
            scratch_shapes=scratch_shapes),
        compiler_params=pltpu.CompilerParams(
            dimension_semantics=("parallel", "arbitrary"),
            vmem_limit_bytes=vmem_limit),
    )(hcol_tm, v_flat, v_t, U_m, wab, wc, bias)

    out = out_flat.reshape(Bp, T, De)[:B].transpose(0, 2, 1)   # (B, De, T)
    a = a_flat.reshape(Bp, T, Dc)[:B].transpose(0, 2, 1)       # (B, Dc, T)
    return out, a


hierarchical_attention_forward = jax.jit(
    _hierarchical_attention_forward,
    static_argnames=("batch_block", "n_block", "mxu_dtype"))


# --------------------------------------------------------------------------- #
# Pure-JAX reference (mirrors the PyTorch module, f32 throughout)
# --------------------------------------------------------------------------- #
def hierarchical_attention_reference(h, v, U, wa_w, wa_b, wb_w, wb_b,
                                     ca_w, ca_b, cb_w, cb_b):
    B, De, T = h.shape
    Dc = v.shape[1]
    K = ca_w.shape[2]
    vf = v.reshape(B, Dc, -1)

    aux = jnp.einsum("bet,ec->btc", h, U)
    S = jnp.einsum("btc,bcn->btn", aux, vf)
    w = jax.nn.softmax(S, axis=2)
    a = jnp.einsum("btn,bcn->bct", w, vf)                      # (B, Dc, T)

    a_a = jnp.einsum("ec,bct->bet", wa_w, a) + wa_b[None, :, None]
    a_b = jnp.einsum("ec,bct->bet", wb_w, a) + wb_b[None, :, None]

    hp = jnp.pad(h, ((0, 0), (0, 0), (K - 1, 0)))

    def causal_conv(w_oik, b_o):
        out = b_o[None, :, None]
        for k in range(K):
            out = out + jnp.einsum("oi,bit->bot", w_oik[:, :, k], hp[:, :, k:k + T])
        return out

    h_a = causal_conv(ca_w, ca_b) + a_a
    h_b = causal_conv(cb_w, cb_b) + a_b
    return h_a * jax.nn.sigmoid(h_b), a


def _rel_l2(x, y):
    x = jnp.asarray(x, jnp.float32)
    y = jnp.asarray(y, jnp.float32)
    return float(jnp.linalg.norm(x - y) / (jnp.linalg.norm(y) + 1e-12))


if __name__ == "__main__":
    K = 3
    # N = 16*32 = 512 -> two N grid steps of 256 (exercises the online softmax).
    B, De, Dc, T, H, W = 2, 32, 16, 8, 16, 32

    key = jax.random.PRNGKey(0)
    keys = jax.random.split(key, 11)
    h = jax.random.normal(keys[0], (B, De, T), dtype=jnp.float32)
    v = jax.random.normal(keys[1], (B, Dc, H, W), dtype=jnp.float32)
    U = 0.1 * jax.random.normal(keys[2], (De, Dc), dtype=jnp.float32)
    wa_w = 0.1 * jax.random.normal(keys[3], (De, Dc), dtype=jnp.float32)
    wa_b = 0.1 * jax.random.normal(keys[4], (De,), dtype=jnp.float32)
    wb_w = 0.1 * jax.random.normal(keys[5], (De, Dc), dtype=jnp.float32)
    wb_b = 0.1 * jax.random.normal(keys[6], (De,), dtype=jnp.float32)
    ca_w = 0.1 * jax.random.normal(keys[7], (De, De, K), dtype=jnp.float32)
    ca_b = 0.1 * jax.random.normal(keys[8], (De,), dtype=jnp.float32)
    cb_w = 0.1 * jax.random.normal(keys[9], (De, De, K), dtype=jnp.float32)
    cb_b = 0.1 * jax.random.normal(keys[10], (De,), dtype=jnp.float32)

    args = (h, v, U, wa_w, wa_b, wb_w, wb_b, ca_w, ca_b, cb_w, cb_b)
    ref_out, ref_a = hierarchical_attention_reference(*args)

    # 1) f32-MXU config: validates structure (im2col conv, stacked weights,
    #    2-step online softmax, grid/output plumbing) against the reference.
    out32, a32 = jax.block_until_ready(
        hierarchical_attention_forward(*args, mxu_dtype=jnp.float32))
    assert out32.shape == (B, De, T) and a32.shape == (B, Dc, T)
    assert jnp.allclose(a32, ref_a, atol=1e-2, rtol=1e-2), \
        float(jnp.max(jnp.abs(a32 - ref_a)))
    assert jnp.allclose(out32, ref_out, atol=1e-2, rtol=1e-2), \
        float(jnp.max(jnp.abs(out32 - ref_out)))

    # 2) Same precision but a forced 2x2 grid (2 batch blocks x 2 N blocks).
    out_bb, a_bb = jax.block_until_ready(
        hierarchical_attention_forward(*args, batch_block=1,
                                       mxu_dtype=jnp.float32))
    assert jnp.allclose(a_bb, ref_a, atol=1e-2, rtol=1e-2)
    assert jnp.allclose(out_bb, ref_out, atol=1e-2, rtol=1e-2)

    # 3) Default performance config (bf16 MXU operands, f32 accumulation):
    #    looser check, the bound reflects bf16 rounding through the softmax.
    out_bf, a_bf = jax.block_until_ready(hierarchical_attention_forward(*args))
    assert _rel_l2(a_bf, ref_a) < 0.15, _rel_l2(a_bf, ref_a)
    assert _rel_l2(out_bf, ref_out) < 0.15, _rel_l2(out_bf, ref_out)

    print("KERNEL_OK")
</pallas_src>

<mosaic_0001>
module attributes {stable_mosaic.version = 11 : i64} {
  func.func @_hier_attn_kernel(%arg0: i32, %arg1: i32, %arg2: memref<16x96xf32, #tpu.memory_space<vmem>>, %arg3: memref<2x16x256xf32, #tpu.memory_space<vmem>>, %arg4: memref<2x256x16xf32, #tpu.memory_space<vmem>>, %arg5: memref<32x16xf32, #tpu.memory_space<vmem>>, %arg6: memref<16x64xf32, #tpu.memory_space<vmem>>, %arg7: memref<96x64xf32, #tpu.memory_space<vmem>>, %arg8: memref<1x64xf32, #tpu.memory_space<vmem>>, %arg9: memref<16x32xf32, #tpu.memory_space<vmem>>, %arg10: memref<16x16xf32, #tpu.memory_space<vmem>>, %arg11: memref<2x8x16xf32, #tpu.memory_space<vmem>>, %arg12: memref<2x8x1xf32, #tpu.memory_space<vmem>>, %arg13: memref<2x8x1xf32, #tpu.memory_space<vmem>>, %arg14: memref<2x8x16xf32, #tpu.memory_space<vmem>>) attributes {dimension_semantics = [#tpu.dimension_semantics<parallel>, #tpu.dimension_semantics<arbitrary>], iteration_bounds = array<i64: 1, 2>, scalar_prefetch = 0 : i64, scratch_operands = 4 : i64, tpu.core_type = #tpu.core_type<tc>, window_params = [{transform_indices = @transform_0, window_bounds = array<i64: 16, 96>}, {transform_indices = @transform_1, window_bounds = array<i64: 2, 16, 256>}, {transform_indices = @transform_2, window_bounds = array<i64: 2, 256, 16>}, {pipeline_mode = #tpu.pipeline_mode<synchronous>, transform_indices = @transform_3, window_bounds = array<i64: 32, 16>}, {pipeline_mode = #tpu.pipeline_mode<synchronous>, transform_indices = @transform_4, window_bounds = array<i64: 16, 64>}, {pipeline_mode = #tpu.pipeline_mode<synchronous>, transform_indices = @transform_5, window_bounds = array<i64: 96, 64>}, {pipeline_mode = #tpu.pipeline_mode<synchronous>, transform_indices = @transform_6, window_bounds = array<i64: 1, 64>}, {transform_indices = @transform_7, window_bounds = array<i64: 16, 32>}, {transform_indices = @transform_8, window_bounds = array<i64: 16, 16>}]} {
    %c0_i32 = arith.constant 0 : i32
    %0 = arith.cmpi eq, %arg1, %c0_i32 : i32
    %1 = arith.extui %0 : i1 to i32
    %c0_i32_0 = arith.constant 0 : i32
    %2 = arith.cmpi ne, %1, %c0_i32_0 : i32
    scf.if %2 {
      %c0_31 = arith.constant 0 : index
      %c0_32 = arith.constant 0 : index
      %32 = vector.load %arg2[%c0_31, %c0_32] : memref<16x96xf32, #tpu.memory_space<vmem>>, vector<16x32xf32>
      %c0_33 = arith.constant 0 : index
      %c0_34 = arith.constant 0 : index
      %33 = vector.load %arg5[%c0_33, %c0_34] : memref<32x16xf32, #tpu.memory_space<vmem>>, vector<32x16xf32>
      %cst_35 = arith.constant dense<0.000000e+00> : vector<16x16xf32>
      %34 = tpu.matmul %32, %33, %cst_35 {dimension_numbers = #tpu.dot_dimension_numbers<[1], [0], [0], [1], [0, 0, 1, 1], [], []>} : vector<16x32xf32>, vector<32x16xf32>, vector<16x16xf32> -> vector<16x16xf32>
      %35 = vector.shape_cast %34 : vector<16x16xf32> to vector<2x8x16xf32>
      %c0_36 = arith.constant 0 : index
      %c0_37 = arith.constant 0 : index
      %c0_38 = arith.constant 0 : index
      %36 = vector.load %arg11[%c0_36, %c0_37, %c0_38] : memref<2x8x16xf32, #tpu.memory_space<vmem>>, vector<2x8x16xf32>
      tpu.vector_store %arg11[%c0_36, %c0_37, %c0_38], %35 {strides = array<i32>} : memref<2x8x16xf32, #tpu.memory_space<vmem>>, vector<2x8x16xf32>,
      %cst_39 = arith.constant 0xFF800000 : f32
      %37 = vector.broadcast %cst_39 : f32 to vector<2x8x1xf32>
      %c0_40 = arith.constant 0 : index
      %c0_41 = arith.constant 0 : index
      %c0_42 = arith.constant 0 : index
      %38 = vector.load %arg12[%c0_40, %c0_41, %c0_42] : memref<2x8x1xf32, #tpu.memory_space<vmem>>, vector<2x8x1xf32>
      tpu.vector_store %arg12[%c0_40, %c0_41, %c0_42], %37 {strides = array<i32>} : memref<2x8x1xf32, #tpu.memory_space<vmem>>, vector<2x8x1xf32>,
      %cst_43 = arith.constant 0.000000e+00 : f32
      %39 = vector.broadcast %cst_43 : f32 to vector<2x8x1xf32>
      %c0_44 = arith.constant 0 : index
      %c0_45 = arith.constant 0 : index
      %c0_46 = arith.constant 0 : index
      %40 = vector.load %arg13[%c0_44, %c0_45, %c0_46] : memref<2x8x1xf32, #tpu.memory_space<vmem>>, vector<2x8x1xf32>
      tpu.vector_store %arg13[%c0_44, %c0_45, %c0_46], %39 {strides = array<i32>} : memref<2x8x1xf32, #tpu.memory_space<vmem>>, vector<2x8x1xf32>,
      %cst_47 = arith.constant 0.000000e+00 : f32
      %41 = vector.broadcast %cst_47 : f32 to vector<2x8x16xf32>
      %c0_48 = arith.constant 0 : index
      %c0_49 = arith.constant 0 : index
      %c0_50 = arith.constant 0 : index
      %42 = vector.load %arg14[%c0_48, %c0_49, %c0_50] : memref<2x8x16xf32, #tpu.memory_space<vmem>>, vector<2x8x16xf32>
      tpu.vector_store %arg14[%c0_48, %c0_49, %c0_50], %41 {strides = array<i32>} : memref<2x8x16xf32, #tpu.memory_space<vmem>>, vector<2x8x16xf32>,
    } else {
    }
    %c0 = arith.constant 0 : index
    %c0_1 = arith.constant 0 : index
    %c0_2 = arith.constant 0 : index
    %3 = vector.load %arg11[%c0, %c0_1, %c0_2] : memref<2x8x16xf32, #tpu.memory_space<vmem>>, vector<2x8x16xf32>
    %c0_3 = arith.constant 0 : index
    %c0_4 = arith.constant 0 : index
    %c0_5 = arith.constant 0 : index
    %4 = vector.load %arg3[%c0_3, %c0_4, %c0_5] : memref<2x16x256xf32, #tpu.memory_space<vmem>>, vector<2x16x256xf32>
    %cst = arith.constant dense<0.000000e+00> : vector<2x8x256xf32>
    %5 = tpu.matmul %3, %4, %cst {dimension_numbers = #tpu.dot_dimension_numbers<[2], [1], [1], [2], [0, 0, 0, 1, 1, 2], [0], [0]>} : vector<2x8x16xf32>, vector<2x16x256xf32>, vector<2x8x256xf32> -> vector<2x8x256xf32>
    %c0_6 = arith.constant 0 : index
    %c0_7 = arith.constant 0 : index
    %c0_8 = arith.constant 0 : index
    %6 = vector.load %arg12[%c0_6, %c0_7, %c0_8] : memref<2x8x1xf32, #tpu.memory_space<vmem>>, vector<2x8x1xf32>
    %cst_9 = arith.constant dense<0xFF800000> : vector<2x8xf32>
    %7 = vector.multi_reduction <maximumf>, %5, %cst_9 [2] : vector<2x8x256xf32> to vector<2x8xf32>
    %8 = vector.shape_cast %7 : vector<2x8xf32> to vector<2x8x1xf32>
    %9 = arith.maximumf %6, %8 : vector<2x8x1xf32>
    %10 = arith.subf %6, %9 : vector<2x8x1xf32>
    %11 = math.exp %10 : vector<2x8x1xf32>
    %12 = vector.broadcast %9 : vector<2x8x1xf32> to vector<2x8x256xf32>
    %13 = arith.subf %5, %12 : vector<2x8x256xf32>
    %14 = math.exp %13 : vector<2x8x256xf32>
    %c0_10 = arith.constant 0 : index
    %c0_11 = arith.constant 0 : index
    %c0_12 = arith.constant 0 : index
    %15 = vector.load %arg13[%c0_10, %c0_11, %c0_12] : memref<2x8x1xf32, #tpu.memory_space<vmem>>, vector<2x8x1xf32>
    %16 = arith.mulf %11, %15 : vector<2x8x1xf32>
    %cst_13 = arith.constant dense<0.000000e+00> : vector<2x8xf32>
    %17 = vector.multi_reduction <add>, %14, %cst_13 [2] : vector<2x8x256xf32> to vector<2x8xf32>
    %18 = vector.shape_cast %17 : vector<2x8xf32> to vector<2x8x1xf32>
    %19 = arith.addf %16, %18 : vector<2x8x1xf32>
    %c0_14 = arith.constant 0 : index
    %c0_15 = arith.constant 0 : index
    %c0_16 = arith.constant 0 : index
    %20 = vector.load %arg13[%c0_14, %c0_15, %c0_16] : memref<2x8x1xf32, #tpu.memory_space<vmem>>, vector<2x8x1xf32>
    tpu.vector_store %arg13[%c0_14, %c0_15, %c0_16], %19 {strides = array<i32>} : memref<2x8x1xf32, #tpu.memory_space<vmem>>, vector<2x8x1xf32>,
    %c0_17 = arith.constant 0 : index
    %c0_18 = arith.constant 0 : index
    %c0_19 = arith.constant 0 : index
    %21 = vector.load %arg4[%c0_17, %c0_18, %c0_19] : memref<2x256x16xf32, #tpu.memory_space<vmem>>, vector<2x256x16xf32>
    %cst_20 = arith.constant dense<0.000000e+00> : vector<2x8x16xf32>
    %22 = tpu.matmul %14, %21, %cst_20 {dimension_numbers = #tpu.dot_dimension_numbers<[2], [1], [1], [2], [0, 0, 0, 1, 1, 2], [0], [0]>} : vector<2x8x256xf32>, vector<2x256x16xf32>, vector<2x8x16xf32> -> vector<2x8x16xf32>
    %c0_21 = arith.constant 0 : index
    %c0_22 = arith.constant 0 : index
    %c0_23 = arith.constant 0 : index
    %23 = vector.load %arg14[%c0_21, %c0_22, %c0_23] : memref<2x8x16xf32, #tpu.memory_space<vmem>>, vector<2x8x16xf32>
    %24 = vector.broadcast %11 : vector<2x8x1xf32> to vector<2x8x16xf32>
    %25 = arith.mulf %24, %23 : vector<2x8x16xf32>
    %26 = arith.addf %25, %22 : vector<2x8x16xf32>
    %c0_24 = arith.constant 0 : index
    %c0_25 = arith.constant 0 : index
    %c0_26 = arith.constant 0 : index
    %27 = vector.load %arg14[%c0_24, %c0_25, %c0_26] : memref<2x8x16xf32, #tpu.memory_space<vmem>>, vector<2x8x16xf32>
    tpu.vector_store %arg14[%c0_24, %c0_25, %c0_26], %26 {strides = array<i32>} : memref<2x8x16xf32, #tpu.memory_space<vmem>>, vector<2x8x16xf32>,
    %c0_27 = arith.constant 0 : index
    %c0_28 = arith.constant 0 : index
    %c0_29 = arith.constant 0 : index
    %28 = vector.load %arg12[%c0_27, %c0_28, %c0_29] : memref<2x8x1xf32, #tpu.memory_space<vmem>>, vector<2x8x1xf32>
    tpu.vector_store %arg12[%c0_27, %c0_28, %c0_29], %9 {strides = array<i32>} : memref<2x8x1xf32, #tpu.memory_space<vmem>>, vector<2x8x1xf32>,
    %c1_i32 = arith.constant 1 : i32
    %29 = arith.cmpi eq, %arg1, %c1_i32 : i32
    %30 = arith.extui %29 : i1 to i32
    %c0_i32_30 = arith.constant 0 : i32
    %31 = arith.cmpi ne, %30, %c0_i32_30 : i32
    scf.if %31 {
      %c0_31 = arith.constant 0 : index
      %c0_32 = arith.constant 0 : index
      %c0_33 = arith.constant 0 : index
      %32 = vector.load %arg13[%c0_31, %c0_32, %c0_33] : memref<2x8x1xf32, #tpu.memory_space<vmem>>, vector<2x8x1xf32>
      %33 = tpu.reciprocal %32 {approx = true} : vector<2x8x1xf32> -> vector<2x8x1xf32>
      %c0_34 = arith.constant 0 : index
      %c0_35 = arith.constant 0 : index
      %c0_36 = arith.constant 0 : index
      %34 = vector.load %arg14[%c0_34, %c0_35, %c0_36] : memref<2x8x16xf32, #tpu.memory_space<vmem>>, vector<2x8x16xf32>
      %35 = vector.broadcast %33 : vector<2x8x1xf32> to vector<2x8x16xf32>
      %36 = arith.mulf %34, %35 : vector<2x8x16xf32>
      %37 = vector.shape_cast %36 : vector<2x8x16xf32> to vector<16x16xf32>
      %c0_37 = arith.constant 0 : index
      %c0_38 = arith.constant 0 : index
      %38 = vector.load %arg10[%c0_37, %c0_38] : memref<16x16xf32, #tpu.memory_space<vmem>>, vector<16x16xf32>
      tpu.vector_store %arg10[%c0_37, %c0_38], %37 {strides = array<i32>} : memref<16x16xf32, #tpu.memory_space<vmem>>, vector<16x16xf32>,
      %c0_39 = arith.constant 0 : index
      %c0_40 = arith.constant 0 : index
      %39 = vector.load %arg6[%c0_39, %c0_40] : memref<16x64xf32, #tpu.memory_space<vmem>>, vector<16x64xf32>
      %cst_41 = arith.constant dense<0.000000e+00> : vector<16x64xf32>
      %40 = tpu.matmul %37, %39, %cst_41 {dimension_numbers = #tpu.dot_dimension_numbers<[1], [0], [0], [1], [0, 0, 1, 1], [], []>} : vector<16x16xf32>, vector<16x64xf32>, vector<16x64xf32> -> vector<16x64xf32>
      %c0_42 = arith.constant 0 : index
      %c0_43 = arith.constant 0 : index
      %41 = vector.load %arg2[%c0_42, %c0_43] : memref<16x96xf32, #tpu.memory_space<vmem>>, vector<16x96xf32>
      %c0_44 = arith.constant 0 : index
      %c0_45 = arith.constant 0 : index
      %42 = vector.load %arg7[%c0_44, %c0_45] : memref<96x64xf32, #tpu.memory_space<vmem>>, vector<96x64xf32>
      %cst_46 = arith.constant dense<0.000000e+00> : vector<16x64xf32>
      %43 = tpu.matmul %41, %42, %cst_46 {dimension_numbers = #tpu.dot_dimension_numbers<[1], [0], [0], [1], [0, 0, 1, 1], [], []>} : vector<16x96xf32>, vector<96x64xf32>, vector<16x64xf32> -> vector<16x64xf32>
      %44 = arith.addf %40, %43 : vector<16x64xf32>
      %c0_47 = arith.constant 0 : index
      %c0_48 = arith.constant 0 : index
      %45 = vector.load %arg8[%c0_47, %c0_48] : memref<1x64xf32, #tpu.memory_space<vmem>>, vector<1x64xf32>
      %46 = vector.broadcast %45 : vector<1x64xf32> to vector<16x64xf32>
      %47 = arith.addf %44, %46 : vector<16x64xf32>
      %48 = vector.extract_strided_slice %47 {offsets = [0, 0], sizes = [16, 32], strides = [1, 1]} : vector<16x64xf32> to vector<16x32xf32>
      %49 = vector.extract_strided_slice %47 {offsets = [0, 32], sizes = [16, 32], strides = [1, 1]} : vector<16x64xf32> to vector<16x32xf32>
      %cst_49 = arith.constant 0.000000e+00 : f32
      %50 = vector.broadcast %cst_49 : f32 to vector<16x32xf32>
      %51 = arith.subf %50, %49 : vector<16x32xf32>
      %52 = math.exp %51 : vector<16x32xf32>
      %cst_50 = arith.constant 1.000000e+00 : f32
      %53 = vector.broadcast %cst_50 : f32 to vector<16x32xf32>
      %54 = arith.addf %53, %52 : vector<16x32xf32>
      %55 = tpu.reciprocal %54 {approx = true} : vector<16x32xf32> -> vector<16x32xf32>
      %56 = arith.mulf %48, %55 : vector<16x32xf32>
      %c0_51 = arith.constant 0 : index
      %c0_52 = arith.constant 0 : index
      %57 = vector.load %arg9[%c0_51, %c0_52] : memref<16x32xf32, #tpu.memory_space<vmem>>, vector<16x32xf32>
      tpu.vector_store %arg9[%c0_51, %c0_52], %56 {strides = array<i32>} : memref<16x32xf32, #tpu.memory_space<vmem>>, vector<16x32xf32>,
    } else {
    }
    return
  }
  func.func @transform_0(%arg0: i32, %arg1: i32) -> (i32, i32) {
    %c0_i32 = arith.constant 0 : i32
    %c0_i32_0 = arith.constant 0 : i32
    return %arg0, %c0_i32 : i32, i32
  }
  func.func @transform_1(%arg0: i32, %arg1: i32) -> (i32, i32, i32) {
    %c0_i32 = arith.constant 0 : i32
    %c0_i32_0 = arith.constant 0 : i32
    return %arg0, %c0_i32, %arg1 : i32, i32, i32
  }
  func.func @transform_2(%arg0: i32, %arg1: i32) -> (i32, i32, i32) {
    %c0_i32 = arith.constant 0 : i32
    %c0_i32_0 = arith.constant 0 : i32
    return %arg0, %arg1, %c0_i32 : i32, i32, i32
  }
  func.func @transform_3(%arg0: i32, %arg1: i32) -> (i32, i32) {
    %c0_i32 = arith.constant 0 : i32
    %c0_i32_0 = arith.constant 0 : i32
    %c0_i32_1 = arith.constant 0 : i32
    return %c0_i32, %c0_i32_0 : i32, i32
  }
  func.func @transform_4(%arg0: i32, %arg1: i32) -> (i32, i32) {
    %c0_i32 = arith.constant 0 : i32
    %c0_i32_0 = arith.constant 0 : i32
    %c0_i32_1 = arith.constant 0 : i32
    return %c0_i32, %c0_i32_0 : i32, i32
  }
  func.func @transform_5(%arg0: i32, %arg1: i32) -> (i32, i32) {
    %c0_i32 = arith.constant 0 : i32
    %c0_i32_0 = arith.constant 0 : i32
    %c0_i32_1 = arith.constant 0 : i32
    return %c0_i32, %c0_i32_0 : i32, i32
  }
  func.func @transform_6(%arg0: i32, %arg1: i32) -> (i32, i32) {
    %c0_i32 = arith.constant 0 : i32
    %c0_i32_0 = arith.constant 0 : i32
    %c0_i32_1 = arith.constant 0 : i32
    return %c0_i32, %c0_i32_0 : i32, i32
  }
  func.func @transform_7(%arg0: i32, %arg1: i32) -> (i32, i32) {
    %c0_i32 = arith.constant 0 : i32
    %c0_i32_0 = arith.constant 0 : i32
    return %arg0, %c0_i32 : i32, i32
  }
  func.func @transform_8(%arg0: i32, %arg1: i32) -> (i32, i32) {
    %c0_i32 = arith.constant 0 : i32
    %c0_i32_0 = arith.constant 0 : i32
    return %arg0, %c0_i32 : i32, i32
  }
}

</mosaic_0001>

<bundles_post_ra>
// kernel: _hierarchical_attention_forward.1
= control target key start
LH: loop header
LB: loop body
LE: loop exit
PB: predicated region body
PF: predicated region fallthrough
CT: control target
= control target key end

     0   :  { %s2727_s0 = inlined_call_operand.hbm [shape: f32[16,96], index: 0, kind: input, shape index: {}]   ;;  %s2728_s1 = inlined_call_operand.hbm [shape: f32[2,16,512], index: 1, kind: input, shape index: {}]   ;;  %s2729_s2 = inlined_call_operand.hbm [shape: f32[2,512,16], index: 2, kind: input, shape index: {}]   ;;  %s2730_s3 = inlined_call_operand.hbm [shape: f32[32,16], index: 3, kind: input, shape index: {}]   ;;  %s2731_s4 = inlined_call_operand.hbm [shape: f32[16,64], index: 4, kind: input, shape index: {}]   ;;  %s2732_s5 = inlined_call_operand.hbm [shape: f32[96,64], index: 5, kind: input, shape index: {}]   ;;  %s2733_s6 = inlined_call_operand.hbm [shape: f32[1,64], index: 6, kind: input, shape index: {}]   ;;  %s2734_s7 = inlined_call_operand.hbm [shape: f32[16,32], index: 7, kind: output, shape index: {0}]   ;;  %s2735_s8 = inlined_call_operand.hbm [shape: f32[16,16], index: 8, kind: output, shape index: {1}]  }
   0x1   :  { %2743 = sst [smem:[#allocation33_spill]] %s2730_s3 }
   0x2   :  { %2744 = sst [smem:[#allocation34_spill]] %s2734_s7 }
   0x3   :  { %2745 = sst [smem:[#allocation35_spill]] %s2735_s8 }
   0x4   :  { %14 = vsyncpa [#allocation7], 0 }
   0x5   :  { %15 = vsyncpa [#allocation10], 0 }
   0x6   :  { %17 = vsyncpa [#allocation10 + $0x1], 0 }
   0x7   :  { %18 = vsyncpa [#allocation13], 0 }
   0x8   :  { %19 = vsyncpa [#allocation16], 0 }
   0x9   :  { %20 = vsyncpa [#allocation8], 0 }
   0xa   :  { %21 = vsyncpa [#allocation20], 0  ;;  %s2270_s27 = smov 0   ;;  %s2272_s28 = smov 0  }
   0xb   :  { %s2274_s29 = smov 0   ;;  %s2276_s30 = smov 0  }
   0xc   :  { %s2278_s9 = smov 0   ;;  %s2280_s10 = smov 0  }
   0xd LB: > { %2746 = sst [smem:[#allocation30_spill]] %s2188_s30  ;;  %s2299_s11 = sadd.s32 4294967295, %s2196_s10   ;;  %s2196_s10 = sphi %s2280_s10, %s27_s10   ;;  %s2192_s9 = sphi %s2278_s9, %s2774_s9   ;;  %s2188_s30 = sphi %s2276_s30, %s2773_s30   ;;  %s2184_s29 = sphi %s2274_s29, %s2772_s29   ;;  %s2180_s28 = sphi %s2272_s28, %s2771_s28   ;;  %s2176_s27 = sphi %s2270_s27, %s2770_s27  }
   0xe   : > { %s36_s12 = sadd.s32 1, %s2192_s9  ;;  %s74_s13 = sadd.s32 1, %s2184_s29 }
   0xf   : > { %p37_p0 = scmp.ge.s32.totalorder %s36_s12, 2  ;;  %p81_p1 = scmp.ne.s32.totalorder %s2184_s29, %s2180_s28 }
  0x10   : > { %p82_p2 = scmp.eq.s32.totalorder %s2196_s10, 0  ;;  %p87_p4 = scmp.ne.s32.totalorder %s2180_s28, %s2176_s27 }
  0x11   : > { %s2776_s12 = smov (%p37_p0, %s36_s12), 0  ;;  %p2736_p5 = scmp.eq.s32.totalorder %s2299_s11, 0 }
  0x12   : > { %2747 = sst [smem:[#allocation31_spill]] %s2776_s12  ;;  %p2308_p3 = por %p82_p2, %p81_p1 }
  0x13   : > { %s70_s15 = ssub.s32 %s2192_s9, %s2776_s12  ;;  %p1445_p7 = scmp.ge.s32.totalorder %s2196_s10, 1 }
  0x14   : > { %s2748_s14 = scalar_select %p2308_p3, 1, 0 }
  0x15   : > { %p72_p6 = scmp.eq.s32.totalorder %s70_s15, 0  ;;  %p2319_p8 = por %p2736_p5, %p87_p4 }
  0x16   : > { %p262_p9 = scmp.lt.s32.totalorder %s2196_s10, 3  ;;  %s2198_s19 = smov [#allocation12]  }
  0x17   : > { %s2749_s16 = scalar_select %p2319_p8, 1, 0 }
  0x18   : > { %s2325_s17 = scalar_select %p72_p6, %s2184_s29, %s74_s13  }
  0x19   : > { %p2327_p10 = pnand %p1445_p7, %p262_p9  ;;  %s290_s20 = sshll.u32 %s2198_s19, 4  ;;  %s291_s20 = int_to_ptr.vmem [resolvable:$true] %s290_s20 }
  0x1a   : > { %2750 = sst [smem:[#allocation32_spill]] %s2325_s17  ;;  %s2199_s22 = smov [#allocation15]  }
  0x1b   : > { %s2751_s18 = scalar_select %p2327_p10, 1, 0 }
  0x1c   : > { %p1775_p11 = pneg %p2327_p10  ;;  %s316_s23 = sshll.u32 %s2199_s22, 4  ;;  %s2339_s23 = int_to_ptr.vmem [resolvable:$true] %s316_s23 }
  0x1d   : > { %s2753_s3 = sld [smem:[#allocation33_spill]] }
  0x1e   : > { %p2335_p12 = pnand %p1775_p11, %p2736_p5 }
  0x20   : > { %p2349_p0 = pneg %p2335_p12 }
  0x23   : > { %s1906_s26 = scalar_lea.hbm %s2753_s3, 512 }
  0x24   : > { %p1907_p13 = scmp.ne.s32.totalorder %s2753_s3, %s1906_s26  ;;  %p1913_p4 = scmp.lt.u32.totalorder %s1906_s26, %s2753_s3 }
  0x26   : > { %p1909_p1 = pnand %p2349_p0, %p1907_p13 }
  0x28   : > { %p1910_p2 = pneg %p1909_p1 }
  0x2a   : > { %p1915_p6 = pnand %p1913_p4, %p1910_p2 }
  0x2c   : > { %1918 = shalt.err (!%p1915_p6)
}
  0x2d   : > { %s1919_s24 = scalar_lea.vmem %s291_s20, 512  ;;  %p1927_p5 = scmp.lt.s32.totalorder %s291_s20, %s291_s20 }
  0x2e   : > { %p1920_p7 = scmp.ne.s32.totalorder %s291_s20, %s1919_s24  ;;  %p1928_p8 = scmp.lt.s32.totalorder %s1919_s24, %s1919_s24 }
  0x30   : > { %p1922_p9 = pnand %p1920_p7, %p2349_p0  ;;  %p1929_p10 = por %p1928_p8, %p1927_p5 }
  0x32   : > { %p1923_p11 = pneg %p1922_p9 }
  0x34   : > { %p1930_p3 = pnand %p1929_p10, %p1923_p11 }
  0x36   : > { %1933 = shalt.err (!%p1930_p3)
}
  0x37   : > { %s2200_s25 = smov 128   ;;  %s2201_s27 = smov 8  }
  0x38   : > { %1781 = dma.hbm_to_vmem [thread:$0]  (!%p2335_p12), %s2753_s3, 512, %s291_s20, [#allocation13], %s2200_s25, %s2200_s25, %s2201_s27  }
  0x39   : > { %s1934_s12 = scalar_lea.hbm %s2732_s5, 1536 }
  0x3a   : > { %p1935_p3 = scmp.ne.s32.totalorder %s2732_s5, %s1934_s12  ;;  %p1941_p10 = scmp.lt.u32.totalorder %s1934_s12, %s2732_s5 }
  0x3c   : > { %p1937_p5 = pnand %p1935_p3, %p2349_p0 }
  0x3e   : > { %p1938_p8 = pneg %p1937_p5 }
  0x40   : > { %p1943_p13 = pnand %p1941_p10, %p1938_p8 }
  0x42   : > { %1946 = shalt.err (!%p1943_p13)
}
  0x43   : > { %s1947_s20 = scalar_lea.vmem %s2339_s23, 1536  ;;  %p1955_p6 = scmp.lt.s32.totalorder %s2339_s23, %s2339_s23 }
  0x44   : > { %p1948_p1 = scmp.ne.s32.totalorder %s2339_s23, %s1947_s20  ;;  %p1956_p7 = scmp.lt.s32.totalorder %s1947_s20, %s1947_s20 }
  0x46   : > { %p1950_p2 = pnand %p1948_p1, %p2349_p0  ;;  %p1957_p9 = por %p1956_p7, %p1955_p6 }
  0x48   : > { %p1951_p4 = pneg %p1950_p2 }
  0x4a   : > { %p1958_p11 = pnand %p1957_p9, %p1951_p4 }
  0x4c   : > { %1961 = shalt.err (!%p1958_p11)
}
  0x4d   : > { %1787 = dma.hbm_to_vmem [thread:$0]  (!%p2335_p12), %s2732_s5, 1536, %s2339_s23, [#allocation16], %s2200_s25, %s2200_s25, %s2201_s27  }
  0x4e   : > { %s2202_s12 = smov [#allocation6]   ;;  %s2203_s26 = smov [#allocation14]  }
  0x4f   : > { %s277_s17 = sshll.u32 %s2202_s12, 4  ;;  %s303_s13 = sshll.u32 %s2203_s26, 4  ;;  %s278_s17 = int_to_ptr.vmem [resolvable:$true] %s277_s17  ;;  %s304_s13 = int_to_ptr.vmem [resolvable:$true] %s303_s13 }
  0x50   : > { %s1962_s24 = scalar_lea.hbm %s2727_s0, 256 }
  0x51   : > { %p1963_p3 = scmp.ne.s32.totalorder %s2727_s0, %s1962_s24  ;;  %p1969_p10 = scmp.lt.u32.totalorder %s1962_s24, %s2727_s0 }
  0x53   : > { %p1965_p5 = pnand %p1963_p3, %p2349_p0 }
  0x55   : > { %p1966_p8 = pneg %p1965_p5 }
  0x57   : > { %p1971_p13 = pnand %p1969_p10, %p1966_p8 }
  0x59   : > { %1974 = shalt.err (!%p1971_p13)
}
  0x5a   : > { %s1975_s23 = scalar_lea.vmem %s278_s17, 256  ;;  %p1983_p6 = scmp.lt.s32.totalorder %s278_s17, %s278_s17 }
  0x5b   : > { %p1976_p1 = scmp.ne.s32.totalorder %s278_s17, %s1975_s23  ;;  %p1984_p7 = scmp.lt.s32.totalorder %s1975_s23, %s1975_s23 }
  0x5d   : > { %p1978_p2 = pnand %p1976_p1, %p2349_p0  ;;  %p1985_p9 = por %p1984_p7, %p1983_p6 }
  0x5f   : > { %p1979_p4 = pneg %p1978_p2 }
  0x61   : > { %p1986_p11 = pnand %p1985_p9, %p1979_p4 }
  0x63   : > { %1989 = shalt.err (!%p1986_p11)
}
  0x64   : > { %1778 = dma.hbm_to_vmem [thread:$0]  (!%p2335_p12), %s2727_s0, 256, %s278_s17, [#allocation7], %s2200_s25, %s2200_s25, %s2201_s27  }
  0x65   : > { %s1990_s26 = scalar_lea.hbm %s2731_s4, 256 }
  0x66   : > { %p1991_p3 = scmp.ne.s32.totalorder %s2731_s4, %s1990_s26  ;;  %p1997_p10 = scmp.lt.u32.totalorder %s1990_s26, %s2731_s4 }
  0x68   : > { %p1993_p5 = pnand %p1991_p3, %p2349_p0 }
  0x6a   : > { %p1994_p8 = pneg %p1993_p5 }
  0x6c   : > { %p1999_p13 = pnand %p1997_p10, %p1994_p8 }
  0x6e   : > { %2002 = shalt.err (!%p1999_p13)
}
  0x6f   : > { %s2003_s7 = scalar_lea.vmem %s304_s13, 256  ;;  %p2011_p6 = scmp.lt.s32.totalorder %s304_s13, %s304_s13 }
  0x70   : > { %p2004_p1 = scmp.ne.s32.totalorder %s304_s13, %s2003_s7  ;;  %p2012_p7 = scmp.lt.s32.totalorder %s2003_s7, %s2003_s7 }
  0x72   : > { %p2006_p2 = pnand %p2004_p1, %p2349_p0  ;;  %p2013_p9 = por %p2012_p7, %p2011_p6 }
  0x74   : > { %p2007_p4 = pneg %p2006_p2 }
  0x76   : > { %p2014_p11 = pnand %p2013_p9, %p2007_p4 }
  0x78   : > { %2017 = shalt.err (!%p2014_p11)
}
  0x79   : > { %1784 = dma.hbm_to_vmem [thread:$0]  (!%p2335_p12), %s2731_s4, 256, %s304_s13, [#allocation13], %s2200_s25, %s2200_s25, %s2201_s27  }
  0x7a   : > { %s2204_s3 = smov [#allocation17]   ;;  %s2018_s26 = scalar_lea.hbm %s2733_s6, 16 }
  0x7b   : > { %s330_s30 = sshll.u32 %s2204_s3, 4  ;;  %p2019_p3 = scmp.ne.s32.totalorder %s2733_s6, %s2018_s26  ;;  %s331_s30 = int_to_ptr.vmem [resolvable:$true] %s330_s30 }
  0x7c   : > { %p2025_p10 = scmp.lt.u32.totalorder %s2018_s26, %s2733_s6 }
  0x7d   : > { %p2021_p5 = pnand %p2019_p3, %p2349_p0 }
  0x7f   : > { %p2022_p8 = pneg %p2021_p5 }
  0x81   : > { %p2027_p13 = pnand %p2025_p10, %p2022_p8 }
  0x83   : > { %2030 = shalt.err (!%p2027_p13)
}
  0x84   : > { %s2031_s25 = scalar_lea.vmem %s331_s30, 16  ;;  %s2038_s27 = scalar_lea.vmem %s331_s30, 32 }
  0x85   : > { %p2032_p1 = scmp.ne.s32.totalorder %s331_s30, %s2031_s25  ;;  %p2039_p6 = scmp.lt.s32.totalorder %s331_s30, %s331_s30 }
  0x86   : > { %p2040_p7 = scmp.lt.s32.totalorder %s2038_s27, %s2031_s25 }
  0x87   : > { %p2034_p2 = pnand %p2032_p1, %p2349_p0 }
  0x88   : > { %p2041_p9 = por %p2040_p7, %p2039_p6 }
  0x89   : > { %p2035_p4 = pneg %p2034_p2 }
  0x8b   : > { %p2042_p11 = pnand %p2041_p9, %p2035_p4 }
  0x8d   : > { %2045 = shalt.err (!%p2042_p11)
}
  0x8e   : > { %1790 = dma.hbm_to_vmem [thread:$0]  (!%p2335_p12), %s2733_s6, 16, %s331_s30, [#allocation16]  }
  0x8f   : > { %p1451_p3 = scmp.ge.s32.totalorder %s2196_s10, 2 }
  0x90   : > { %s341_s15 = sand.u32 (!%p1451_p3), 1, %s2196_s10   ;;  %s343_s17 = sand.u32 (!%p1451_p3), 1, %s2184_s29  }
  0x91   : > { %337 = sbr.rel (%p1451_p3) target bundleno = 186 (0xba), region = 36  ;;  %s1452_s23 = sshll.u32 (!%p1451_p3), %s343_s17, 6 }
  0x92   : > { %s1485_s3 = sshll.u32 (!%p1451_p3), %s2192_s9, 8  ;;  %s345_s30 = scalar_lea.vmem (!%p1451_p3), [#allocation9], %s1452_s23 }
  0x93   : > { %s2463_s21 = scalar_lea.hbm (!%p1451_p3), %s2728_s1, %s1485_s3  ;;  %s355_s26 = sshll.u32 (!%p1451_p3), %s345_s30, 4  ;;  %s2465_s26 = int_to_ptr.vmem [resolvable:$true] %s355_s26 }
  0x94   : > { %s2467_s19 = scalar_lea.sflag (!%p1451_p3), [#allocation10], %s341_s15  ;;  %s2046_s22 = scalar_lea.hbm (!%p1451_p3), %s2463_s21, 1024 }
  0x95   : > { %p2047_p12 = scmp.ne.s32.totalorder (!%p1451_p3), %s2463_s21, %s2046_s22  ;;  %p2755_p0 = scmp.ne.s32.totalorder (!%p1451_p3), %s2748_s14, 0 }
  0x96   : > { %s2050_s25 = scalar_lea.hbm (!%p1451_p3), %s2728_s1, 2048  ;;  %p2051_p10 = scmp.lt.u32.totalorder (!%p1451_p3), %s2463_s21, %s2728_s1 }
  0x97   : > { %p2048_p5 = pnand (!%p1451_p3), %p2047_p12, %p2755_p0  ;;  %p2052_p13 = scmp.lt.u32.totalorder (!%p1451_p3), %s2050_s25, %s2046_s22 }
  0x98   : > { %p2054_p2 = scmp.lt.u32.totalorder %s2046_s22, %s2463_s21 }
  0x99   : > { %p2049_p8 = pneg %p2048_p5  ;;  %p2053_p1 = por %p2052_p13, %p2051_p10 }
  0x9b   : > { %p2055_p4 = por %p2054_p2, %p2053_p1 }
  0x9d   : > { %p2056_p6 = pnand %p2055_p4, %p2049_p8 }
  0x9f   : > { %2059 = shalt.err (!%p2056_p6)
}
  0xa0   : > { %s2060_s7 = scalar_lea.vmem %s2465_s26, 1024  ;;  %s2205_s15 = smov [#allocation9]  }
  0xa1   : > { %p2061_p7 = scmp.ne.s32.totalorder %s2465_s26, %s2060_s7  ;;  %s2064_s23 = sshll.u32 %s2205_s15, 4  ;;  %s2065_s23 = int_to_ptr.vmem [resolvable:$false] %s2064_s23 }
  0xa2   : > { %s2066_s3 = scalar_lea.vmem %s2065_s23, 2048  ;;  %p2067_p3 = scmp.lt.s32.totalorder %s2465_s26, %s2065_s23 }
  0xa3   : > { %p2062_p9 = pnand %p2061_p7, %p2755_p0  ;;  %p2068_p12 = scmp.lt.s32.totalorder %s2066_s3, %s2060_s7 }
  0xa5   : > { %p2063_p11 = pneg %p2062_p9  ;;  %p2069_p5 = por %p2068_p12, %p2067_p3 }
  0xa7   : > { %p2070_p10 = pnand %p2069_p5, %p2063_p11 }
  0xa9   : > { %2073 = shalt.err (!%p2070_p10)
}
  0xaa   : > { %s2206_s8 = smov 512   ;;  %s2207_s12 = smov 256  }
  0xab   : > { %s2208_s30 = smov 16  }
  0xac   : > { %1746 = dma.hbm_to_vmem [thread:$0]  (%p2755_p0), %s2463_s21, 1024, %s2465_s26, %s2467_s19, %s2206_s8, %s2207_s12, %s2208_s30  }
  0xad   : > { %s1455_s22 = sshll.u32 %s343_s17, 9  ;;  %s1486_s24 = sshll.u32 %s2192_s9, 12 }
  0xae   : > { %s378_s27 = scalar_lea.hbm %s2729_s2, %s1486_s24  ;;  %s369_s7 = scalar_lea.vmem [#allocation11], %s1455_s22 }
  0xaf   : > { %s1747_s13 = scalar_select %p2755_p0, [#allocation0], [#allocation23] }
  0xb0   : > { %s391_s21 = sshll.u32 %s369_s7, 4  ;;  %s2209_s15 = smov 8192   ;;  %s392_s21 = int_to_ptr.vmem [resolvable:$true] %s391_s21 }
  0xb1   : > { %s383_s26 = sld [smem:[%s1747_s13]]   ;;  %s2210_s23 = smov 4096  }
  0xb2   : > { %1748 = sst [smem:[#allocation22]] (%p2755_p0), %s2209_s15  ;;  %s2211_s17 = smov 32  }
  0xb3   : > { %1749 = sst [smem:[#allocation22 + $0x1]] (%p2755_p0), %s2210_s23  ;;  %s2212_s3 = smov 128  }
  0xb4   : > { %1750 = sst [smem:[#allocation22 + $0x2]] (%p2755_p0), %s2211_s17  ;;  %s2213_s12 = smov 8  }
  0xb5   : > { %1751 = sst [smem:[#allocation22 + $0x3]] (%p2755_p0), %s2212_s3  ;;  %s2214_s22 = smov [#allocation21]  }
  0xb6   : > { %1752 = sst [smem:[#allocation22 + $0x4]] (%p2755_p0), %s2212_s3 }
  0xb7   : > { %s1458_s8 = sshll.u32 %s383_s26, 26  ;;  %1753 = sst [smem:[#allocation22 + $0x5]] (%p2755_p0), %s2213_s12 }
  0xb8   : > { %s1459_s30 = sadd.s32 134217728, %s1458_s8 }
  0xb9   : > { %1754 = dma.general (%p2755_p0), %s378_s27, 8192, %s392_s21, %s2467_s19, %s2214_s22, [#allocation22], %s1459_s30, 0  }
  0xba PF: > { %p2756_p8 = scmp.ne.s32.totalorder %s2751_s18, 0 }
  0xbb   : > { %p2757_p13 = scmp.eq.s32.totalorder (!%p2756_p8), %s2299_s11, 0 }
  0xbc   : > { %416 = sbr.rel (%p2756_p8) target bundleno = 1678 (0x68e), region = 48 }
  0xc3   : > { %2151 = dma.done.wait (%p2757_p13), [#allocation7], 256   ;;  %p2758_p1 = pmov %p2757_p13 }
  0xc4   : > { %s422_s24 = sand.u32 1, %s2299_s11   ;;  %s424_s20 = sand.u32 1, %s2180_s28  }
  0xc5   : > { %2153 = vsyncadd (%p2758_p1), [#allocation7], 4294967040  ;;  %s1462_s25 = sshll.u32 %s424_s20, 6  ;;  %s423_s13 = scalar_lea.sflag [#allocation10], %s422_s24 }
  0xc6   : > { %s2522_s7 = scalar_lea.vmem [#allocation9], %s1462_s25  ;;  %p2759_p0 = scmp.ne.s32.totalorder %s2749_s16, 0 }
  0xc8   : > { %2155 = dma.done.wait (%p2759_p0), %s423_s13, 9216  }
  0xc9   : > { %2157 = vsyncadd (%p2759_p0), %s423_s13, 4294958080  ;;  %s1463_s14 = sshll.u32 %s424_s20, 9  ;;  %p2760_p2 = pmov %p2758_p1 }
  0xca   : > { %s2528_s18 = scalar_lea.vmem [#allocation11], %s1463_s14 }
  0xcb   : > { %2159 = dma.done.wait (%p2760_p2), [#allocation13], 768   ;;  %p2761_p4 = pmov %p2758_p1 }
  0xcc   : > { %p2762_p6 = pmov %p2758_p1 }
  0xcd   : > { %2161 = vsyncadd (%p2761_p4), [#allocation13], 4294966528 }
  0xce   : > { %2163 = dma.done.wait (%p2762_p6), [#allocation16], 1552   ;;  %p2763_p7 = pmov %p2758_p1 }
  0xcf   : > { %s2764_s19 = sld [smem:[#allocation30_spill]] }
  0xd0   : > { %2165 = vsyncadd (%p2763_p7), [#allocation16], 4294965744 }
  0xd5   : > { %p1468_p9 = scmp.ne.s32.totalorder %s2764_s19, 0 }
  0xd6   : > { %v497_v0 = vld [vmem:[#allocation12] sm:$0xff] (!%p1468_p9)  ;;  %v498_v1 = vld [vmem:[#allocation12 + $0x8] sm:$0xff] (!%p1468_p9)  ;;  %v499_v2 = vld [vmem:[#allocation12 + $0x10] sm:$0xff] (!%p1468_p9)  ;;  %vm501_vm0 = vcmask (!%p1468_p9), 261120   ;;  %vm583_vm1 = vcmask (!%p1468_p9), 130048   ;;  %vm586_vm2 = vcmask (!%p1468_p9), 7168  }
  0xd7   : > { %494 = sbr.rel (%p1468_p9) target bundleno = 439 (0x1b7), region = 80  ;;  %v1626_v3 = vpack.c.bf16 (!%p1468_p9), %v498_v1, %v497_v0  ;;  %v500_v4 = vld [vmem:[#allocation12 + $0x18] sm:$0xff] (!%p1468_p9)  ;;  %v495_v5 = vld [vmem:[#allocation6] sm:$0xff] (!%p1468_p9)  ;;  %v2215_v8 = vmov (!%p1468_p9), -inf   ;;  %v2216_v9 = vmov (!%p1468_p9), 0.0  }
  0xd8   : > { %v1630_v6 = vpack.c.bf16 (!%p1468_p9), %v500_v4, %v499_v2  ;;  %1589 = vmatprep.mubr.msk.f32.mxu0 (!%p1468_p9), %vm501_vm0, %v495_v5  ;;  %v496_v7 = vld [vmem:[#allocation6 + $0x8] sm:$0xff] (!%p1468_p9)  ;;  %587 = vst.msk [vmem:[#allocation3] sm:$0xff] (!%p1468_p9), %vm586_vm2, %v2215_v8  ;;  %588 = vst.msk [vmem:[#allocation3 + $0x8] sm:$0xff] (!%p1468_p9), %vm586_vm2, %v2215_v8 }
  0xd9   : > { %1627 = vmatprep.subr.bf16.mxu0 (!%p1468_p9), %v1626_v3  ;;  %589 = vst.msk [vmem:[#allocation4] sm:$0xff] (!%p1468_p9), %vm586_vm2, %v2216_v9  ;;  %590 = vst.msk [vmem:[#allocation4 + $0x8] sm:$0xff] (!%p1468_p9), %vm586_vm2, %v2216_v9 }
  0xda   : > { %1629 = vmatpush3.bf16.msra.mxu0 (!%p1468_p9), %v1626_v3  ;;  %591 = vst.msk [vmem:[#allocation5] sm:$0xff] (!%p1468_p9), %vm583_vm1, %v2216_v9  ;;  %592 = vst.msk [vmem:[#allocation5 + $0x8] sm:$0xff] (!%p1468_p9), %vm583_vm1, %v2216_v9 }
  0xdb   : > { %1631 = vmatprep.subr.bf16.mxu0 (!%p1468_p9), %v1630_v6 }
  0xde   : > { %1633 = vmatpush3.bf16.msra.mxu0 %v1630_v6 }
  0xe1   : > { %1590 = vmatmul.mubr.msk.f32.vlgmr.msra.gmra.mrb[0].mxu0 %vm501_vm0, %v496_v7 }
 0x1b4   : > { %v1591_v10 = vpop.f32.mrb[0].mxu0 }
 0x1b5   : > { %585 = vst.msk [vmem:[#allocation2 + $0x8] sm:$0xff] %vm583_vm1, %v1591_v10  ;;  %v574_v11 = vpop.f32.mrb[1].mxu0 }
 0x1b6   : > { %584 = vst.msk [vmem:[#allocation2] sm:$0xff] %vm583_vm1, %v574_v11 }
 0x1b7 PF: > { %v596_v12 = vld [vmem:[%s2522_s7 + $0x8] sm:$0xff]  ;;  %v598_v13 = vld [vmem:[%s2522_s7 + $0x18] sm:$0xff]  ;;  %v595_v14 = vld [vmem:[%s2522_s7] sm:$0xff]  ;;  %v2217_v17 = vmov 0.0   ;;  %vm603_vm3 = vcmask 130048   ;;  %v2218_v33 = vmov 0  }
 0x1b8   : > { %v1634_v15 = vpack.c.bf16 %v598_v13, %v596_v12  ;;  %v597_v16 = vld [vmem:[%s2522_s7 + $0x10] sm:$0xff]  ;;  %671 = vmatprep.mubr.f32.mxu0 %v2217_v17  ;;  %v600_v18 = vld [vmem:[%s2522_s7 + $0x28] sm:$0xff]  ;;  %v602_v19 = vld [vmem:[%s2522_s7 + $0x38] sm:$0xff]  ;;  %745 = vmatprep.mubr.f32.mxu1 %v2217_v17  ;;  %vm802_vm4 = vcmask 7168   ;;  %s2765_s16 = sld [smem:[#allocation30_spill]] }
 0x1b9   : > { %v1636_v20 = vpack.c.bf16 %v597_v16, %v595_v14  ;;  %v1638_v21 = vpack.c.bf16 %v602_v19, %v600_v18  ;;  %v599_v22 = vld [vmem:[%s2522_s7 + $0x20] sm:$0xff]  ;;  %v601_v23 = vld [vmem:[%s2522_s7 + $0x30] sm:$0xff]  ;;  %1879 = vset.pattern.permute.xlu1 %v2218_v33  ;;  %1880 = vset.pattern.permute.xlu0 %v2218_v33  ;;  %v822_v35 = vld [vmem:[%s2528_s18 + $0x88] sm:$0xff] }
 0x1ba   : > { %1635 = vmatprep.subr.bf16.mxu0 %v1634_v15  ;;  %v1640_v24 = vpack.c.bf16 %v601_v23, %v599_v22  ;;  %v821_v34 = vld [vmem:[%s2528_s18 + $0x80] sm:$0xff]  ;;  %v806_v38 = vld [vmem:[%s2528_s18 + $0x8] sm:$0xff]  ;;  %v823_v39 = vld [vmem:[%s2528_s18 + $0x90] sm:$0xff] }
 0x1bb   : > { %1637 = vmatpush1.bf16.msra.mxu0 %v1636_v20  ;;  %1639 = vmatprep.subr.bf16.mxu1 %v1638_v21  ;;  %v805_v36 = vld [vmem:[%s2528_s18] sm:$0xff]  ;;  %v1642_v37 = vpack.c.bf16 %v822_v35, %v821_v34  ;;  %v824_v40 = vld [vmem:[%s2528_s18 + $0x98] sm:$0xff]  ;;  %v854_v44 = vld [vmem:[%s2528_s18 + $0x188] sm:$0xff] }
 0x1bc   : > { %1641 = vmatpush1.bf16.msra.mxu1 %v1640_v24  ;;  %v594_v26 = vld [vmem:[#allocation2 + $0x8] sm:$0xff]  ;;  %v1644_v41 = vpack.c.bf16 %v806_v38, %v805_v36  ;;  %v1646_v42 = vpack.c.bf16 %v824_v40, %v823_v39  ;;  %v853_v43 = vld [vmem:[%s2528_s18 + $0x180] sm:$0xff]  ;;  %v807_v45 = vld [vmem:[%s2528_s18 + $0x10] sm:$0xff] }
 0x1bd   : > { %v593_v25 = vld [vmem:[#allocation2] sm:$0xff]  ;;  %1643 = vmatprep.subr.bf16.mxu0 %v1642_v37  ;;  %v1674_v46 = vpack.c.bf16 %v854_v44, %v853_v43  ;;  %v808_v47 = vld [vmem:[%s2528_s18 + $0x18] sm:$0xff]  ;;  %v837_v48 = vld [vmem:[%s2528_s18 + $0x100] sm:$0xff] }
 0x1be   : > { %1471 = vmatmul.mubr.msk.f32.vlgmr.msra.gmra.mrb[0].mxu0 %vm603_vm3, %v593_v25  ;;  %v838_v49 = vld [vmem:[%s2528_s18 + $0x108] sm:$0xff]  ;;  %v1648_v50 = vpack.c.bf16 %v808_v47, %v807_v45  ;;  %v825_v52 = vld [vmem:[%s2528_s18 + $0xa0] sm:$0xff]  ;;  %v855_v54 = vld [vmem:[%s2528_s18 + $0x190] sm:$0xff]  ;;  %p1473_p11 = scmp.ne.s32.totalorder %s2765_s16, 1 }
 0x1bf   : > { %1472 = vmatmul.mubr.msk.f32.vlgmr.msra.gmra.mrb[0].mxu1 %vm603_vm3, %v594_v26  ;;  %1645 = vmatpush3.bf16.msra.mxu0 %v1644_v41  ;;  %v1676_v51 = vpack.c.bf16 %v838_v49, %v837_v48  ;;  %v826_v53 = vld [vmem:[%s2528_s18 + $0xa8] sm:$0xff]  ;;  %v856_v56 = vld [vmem:[%s2528_s18 + $0x198] sm:$0xff]  ;;  %v809_v57 = vld [vmem:[%s2528_s18 + $0x20] sm:$0xff]  ;;  %vm1069_vm5 = vcmask (!%p1473_p11), 785408   ;;  %s2220_s27 = smov (!%p1473_p11), 96   ;;  %vm1261_vm6 = vcmask (!%p1473_p11), 261120  }
 0x1c0   : > { %1647 = vmatprep.subr.bf16.mxu0 %v1646_v42  ;;  %1675 = vmatprep.subr.bf16.mxu1 %v1674_v46  ;;  %v1650_v55 = vpack.c.bf16 %v826_v53, %v825_v52  ;;  %v810_v58 = vld [vmem:[%s2528_s18 + $0x28] sm:$0xff]  ;;  %v1678_v59 = vpack.c.bf16 %v856_v56, %v855_v54  ;;  %v839_v60 = vld [vmem:[%s2528_s18 + $0x110] sm:$0xff]  ;;  %v840_v61 = vld [vmem:[%s2528_s18 + $0x118] sm:$0xff] }
 0x1c1   : > { %1677 = vmatpush3.bf16.msra.mxu1 %v1676_v51  ;;  %v827_v62 = vld [vmem:[%s2528_s18 + $0xb0] sm:$0xff]  ;;  %v1680_v63 = vpack.c.bf16 %v840_v61, %v839_v60  ;;  %v828_v0 = vld [vmem:[%s2528_s18 + $0xb8] sm:$0xff]  ;;  %v857_v1 = vld [vmem:[%s2528_s18 + $0x1a0] sm:$0xff]  ;;  %v1652_v3 = vpack.c.bf16 %v810_v58, %v809_v57 }
 0x1c2   : > { %v858_v2 = vld [vmem:[%s2528_s18 + $0x1a8] sm:$0xff]  ;;  %1679 = vmatprep.subr.bf16.mxu1 %v1678_v59  ;;  %v841_v5 = vld [vmem:[%s2528_s18 + $0x120] sm:$0xff]  ;;  %v1654_v6 = vpack.c.bf16 %v828_v0, %v827_v62  ;;  %v811_v7 = vld [vmem:[%s2528_s18 + $0x30] sm:$0xff] }
 0x1c3   : > { %1649 = vmatpush3.bf16.msra.mxu0 %v1648_v50  ;;  %v1682_v4 = vpack.c.bf16 %v858_v2, %v857_v1  ;;  %v812_v8 = vld [vmem:[%s2528_s18 + $0x38] sm:$0xff]  ;;  %v842_v9 = vld [vmem:[%s2528_s18 + $0x128] sm:$0xff]  ;;  %v2589_v12 = vld [vmem:[#allocation3] sm:$0xff] }
 0x1c4   : > { %1651 = vmatprep.subr.bf16.mxu0 %v1650_v55  ;;  %v1684_v10 = vpack.c.bf16 %v842_v9, %v841_v5  ;;  %v1656_v11 = vpack.c.bf16 %v812_v8, %v811_v7  ;;  %v2591_v14 = vld [vmem:[#allocation3 + $0x8] sm:$0xff]  ;;  %v829_v16 = vld [vmem:[%s2528_s18 + $0xc0] sm:$0xff]  ;;  %v859_v18 = vld [vmem:[%s2528_s18 + $0x1b0] sm:$0xff] }
 0x1c5   : > { %1681 = vmatpush3.bf16.msra.mxu1 %v1680_v63  ;;  %v830_v17 = vld [vmem:[%s2528_s18 + $0xc8] sm:$0xff]  ;;  %v860_v20 = vld [vmem:[%s2528_s18 + $0x1b8] sm:$0xff]  ;;  %v813_v21 = vld [vmem:[%s2528_s18 + $0x40] sm:$0xff] }
 0x1c6   : > { %1683 = vmatprep.subr.bf16.mxu1 %v1682_v4  ;;  %v1658_v19 = vpack.c.bf16 %v830_v17, %v829_v16  ;;  %v814_v22 = vld [vmem:[%s2528_s18 + $0x48] sm:$0xff]  ;;  %v1686_v24 = vpack.c.bf16 %v860_v20, %v859_v18  ;;  %v843_v26 = vld [vmem:[%s2528_s18 + $0x130] sm:$0xff]  ;;  %v832_v36 = vld [vmem:[%s2528_s18 + $0xd8] sm:$0xff] }
 0x1c7   : > { %1653 = vmatpush3.bf16.msra.mxu0 %v1652_v3  ;;  %v1660_v25 = vpack.c.bf16 %v814_v22, %v813_v21  ;;  %v831_v35 = vld [vmem:[%s2528_s18 + $0xd0] sm:$0xff]  ;;  %v861_v37 = vld [vmem:[%s2528_s18 + $0x1c0] sm:$0xff]  ;;  %v862_v39 = vld [vmem:[%s2528_s18 + $0x1c8] sm:$0xff] }
 0x1c8   : > { %1655 = vmatprep.subr.bf16.mxu0 %v1654_v6  ;;  %v1662_v38 = vpack.c.bf16 %v832_v36, %v831_v35  ;;  %v815_v40 = vld [vmem:[%s2528_s18 + $0x50] sm:$0xff]  ;;  %v816_v41 = vld [vmem:[%s2528_s18 + $0x58] sm:$0xff]  ;;  %v1690_v43 = vpack.c.bf16 %v862_v39, %v861_v37  ;;  %v845_v45 = vld [vmem:[%s2528_s18 + $0x140] sm:$0xff] }
 0x1c9   : > { %1685 = vmatpush3.bf16.msra.mxu1 %v1684_v10  ;;  %v1664_v44 = vpack.c.bf16 %v816_v41, %v815_v40  ;;  %v846_v46 = vld [vmem:[%s2528_s18 + $0x148] sm:$0xff]  ;;  %v833_v48 = vld [vmem:[%s2528_s18 + $0xe0] sm:$0xff]  ;;  %v863_v50 = vld [vmem:[%s2528_s18 + $0x1d0] sm:$0xff] }
 0x1ca   : > { %1687 = vmatprep.subr.bf16.mxu1 %v1686_v24  ;;  %v1692_v47 = vpack.c.bf16 %v846_v46, %v845_v45  ;;  %v834_v49 = vld [vmem:[%s2528_s18 + $0xe8] sm:$0xff]  ;;  %v864_v52 = vld [vmem:[%s2528_s18 + $0x1d8] sm:$0xff]  ;;  %v817_v53 = vld [vmem:[%s2528_s18 + $0x60] sm:$0xff] }
 0x1cb   : > { %1657 = vmatpush3.bf16.msra.mxu0 %v1656_v11  ;;  %v1666_v51 = vpack.c.bf16 %v834_v49, %v833_v48  ;;  %v818_v54 = vld [vmem:[%s2528_s18 + $0x68] sm:$0xff]  ;;  %v1694_v55 = vpack.c.bf16 %v864_v52, %v863_v50  ;;  %v847_v57 = vld [vmem:[%s2528_s18 + $0x150] sm:$0xff]  ;;  %v848_v58 = vld [vmem:[%s2528_s18 + $0x158] sm:$0xff] }
 0x1cc   : > { %1659 = vmatprep.subr.bf16.mxu0 %v1658_v19  ;;  %v1668_v56 = vpack.c.bf16 %v818_v54, %v817_v53  ;;  %v1696_v59 = vpack.c.bf16 %v848_v58, %v847_v57  ;;  %v835_v60 = vld [vmem:[%s2528_s18 + $0xf0] sm:$0xff]  ;;  %v836_v61 = vld [vmem:[%s2528_s18 + $0xf8] sm:$0xff]  ;;  %v865_v62 = vld [vmem:[%s2528_s18 + $0x1e0] sm:$0xff] }
 0x1cd   : > { %v1670_v63 = vpack.c.bf16 %v836_v61, %v835_v60  ;;  %v866_v0 = vld [vmem:[%s2528_s18 + $0x1e8] sm:$0xff]  ;;  %v819_v1 = vld [vmem:[%s2528_s18 + $0x70] sm:$0xff]  ;;  %v820_v2 = vld [vmem:[%s2528_s18 + $0x78] sm:$0xff] }
 0x1ce   : > { %v1698_v3 = vpack.c.bf16 %v866_v0, %v865_v62  ;;  %v1672_v4 = vpack.c.bf16 %v820_v2, %v819_v1  ;;  %v849_v5 = vld [vmem:[%s2528_s18 + $0x160] sm:$0xff]  ;;  %v850_v6 = vld [vmem:[%s2528_s18 + $0x168] sm:$0xff]  ;;  %v867_v8 = vld [vmem:[%s2528_s18 + $0x1f0] sm:$0xff] }
 0x1cf   : > { %1661 = vmatpush3.bf16.msra.mxu0 %v1660_v25  ;;  %v1700_v7 = vpack.c.bf16 %v850_v6, %v849_v5  ;;  %v868_v9 = vld [vmem:[%s2528_s18 + $0x1f8] sm:$0xff]  ;;  %v851_v11 = vld [vmem:[%s2528_s18 + $0x170] sm:$0xff]  ;;  %v1010_v48 = vld [vmem:[#allocation5 + $0x8] sm:$0xff] }
 0x1d0   : > { %1663 = vmatprep.subr.bf16.mxu0 %v1662_v38  ;;  %v1702_v10 = vpack.c.bf16 %v868_v9, %v867_v8  ;;  %v790_v39 = vld [vmem:[#allocation4] sm:$0xff]  ;;  %v1058_v60 = vld [vmem:[#allocation15 + $0x8] sm:$0xff] (!%p1473_p11)  ;;  %v1059_v61 = vld [vmem:[#allocation15 + $0x10] sm:$0xff] (!%p1473_p11) }
 0x1d1   : > { %v1057_v58 = vld [vmem:[#allocation15] sm:$0xff] (!%p1473_p11)  ;;  %v1060_v62 = vld [vmem:[#allocation15 + $0x18] sm:$0xff] (!%p1473_p11)  ;;  %v1062_v2 = vld [vmem:[#allocation15 + $0x28] sm:$0xff] (!%p1473_p11) }
 0x1d2   : > { %v1710_v0 = vpack.c.bf16 (!%p1473_p11), %v1060_v62, %v1059_v61  ;;  %v1061_v1 = vld [vmem:[#allocation15 + $0x20] sm:$0xff] (!%p1473_p11)  ;;  %v1064_v5 = vld [vmem:[#allocation15 + $0x38] sm:$0xff] (!%p1473_p11)  ;;  %v1066_v9 = vld [vmem:[#allocation15 + $0x48] sm:$0xff] (!%p1473_p11) }
 0x1d3   : > { %1665 = vmatpush3.bf16.msra.mxu0 %v1664_v44 }
 0x1d4   : > { %1667 = vmatprep.subr.bf16.mxu0 %v1666_v51 }
 0x1d7   : > { %1669 = vmatpush3.bf16.msra.mxu0 %v1668_v56 }
 0x1d8   : > { %1671 = vmatprep.subr.bf16.mxu0 %v1670_v63  ;;  %v1706_v63 = vpack.c.bf16 (!%p1473_p11), %v1058_v60, %v1057_v58 }
 0x1db   : > { %1673 = vmatpush3.bf16.msra.mxu0 %v1672_v4  ;;  %v1063_v4 = vld [vmem:[#allocation15 + $0x30] sm:$0xff] (!%p1473_p11) }
 0x1dc   : > { %v1718_v6 = vpack.c.bf16 (!%p1473_p11), %v1064_v5, %v1063_v4 }
 0x291   : > { %v2549_v27 = vpop.f32.mrb[0].mxu0 }
 0x292   : > { %v2551_v28 = vpop.f32.mrb[1].mxu0  ;;  %v2553_v29 = vpop.f32.mrb[0].mxu1 }
 0x293   : > { %v2555_v30 = vpop.f32.mrb[1].mxu1  ;;  %v754_v31 = vmax.f32 %v2549_v27, %v2551_v28 }
 0x294   : > { %v757_v32 = vmax.f32 %v2553_v29, %v2555_v30 }
 0x295   : > { %755 = vmax.xlane.f32.xlu0 %v754_v31  ;;  %v844_v31 = vld [vmem:[%s2528_s18 + $0x138] sm:$0xff] }
 0x296   : > { %v1688_v33 = vpack.c.bf16 %v844_v31, %v843_v26 }
 0x298   : > { %1689 = vmatpush3.bf16.msra.mxu1 %v1688_v33 }
 0x299   : > { %758 = vmax.xlane.f32.xlu0 %v757_v32  ;;  %1691 = vmatprep.subr.bf16.mxu1 %v1690_v43  ;;  %v791_v43 = vld [vmem:[#allocation4 + $0x8] sm:$0xff] }
 0x29c   : > { %1693 = vmatpush3.bf16.msra.mxu1 %v1692_v47 }
 0x29d   : > { %1695 = vmatprep.subr.bf16.mxu1 %v1694_v55 }
 0x2a0   : > { %1697 = vmatpush3.bf16.msra.mxu1 %v1696_v59  ;;  %v2219_v59 = vmov (!%p1473_p11), 0  }
 0x2a1   : > { %1699 = vmatprep.subr.bf16.mxu1 %v1698_v3  ;;  %v1714_v3 = vpack.c.bf16 (!%p1473_p11), %v1062_v2, %v1061_v1 }
 0x2a4   : > { %1701 = vmatpush3.bf16.msra.mxu1 %v1700_v7  ;;  %v1065_v7 = vld [vmem:[#allocation15 + $0x40] sm:$0xff] (!%p1473_p11) }
 0x2a5   : > { %1703 = vmatprep.subr.bf16.mxu1 %v1702_v10  ;;  %v1053_v10 = vld [vmem:[#allocation14] sm:$0xff] (!%p1473_p11) }
 0x322   : > { %v756_v13 = vpop.xlane.xlu0 %755 }
 0x323   : > { %v2594_v15 = vmax.f32 %v2589_v12, %v756_v13  ;;  %v852_v13 = vld [vmem:[%s2528_s18 + $0x178] sm:$0xff] }
 0x324   : > { %v1704_v16 = vpack.c.bf16 %v852_v13, %v851_v11  ;;  %v1054_v11 = vld [vmem:[#allocation14 + $0x8] sm:$0xff] (!%p1473_p11) }
 0x325   : > { %v762_v23 = vsub.f32 %v2589_v12, %v2594_v15  ;;  %1027 = vst.msk [vmem:[#allocation3] sm:$0xff] %vm802_vm4, %v2594_v15  ;;  %770 = vperm.xlu1 %1879, %v2594_v15   ;;  %v1009_v12 = vld [vmem:[#allocation5] sm:$0xff]  ;;  %v1730_v13 = vpack.c.bf16 (!%p1473_p11), %v1054_v11, %v1053_v10 }
 0x326   : > { %v759_v32 = vpop.xlane.xlu0 %758  ;;  %1705 = vmatpush3.bf16.msra.mxu1 %v1704_v16 }
 0x327   : > { %v2610_v34 = vmax.f32 %v2591_v14, %v759_v32  ;;  %1707 = vmatprep.subr.bf16.mxu1 (!%p1473_p11), %v1706_v63  ;;  %1731 = vmatprep.subr.bf16.mxu0 (!%p1473_p11), %v1730_v13 }
 0x329   : > { %v763_v42 = vsub.f32 %v2591_v14, %v2610_v34  ;;  %1028 = vst.msk [vmem:[#allocation3 + $0x8] sm:$0xff] %vm802_vm4, %v2610_v34  ;;  %775 = vperm.xlu1 %1879, %v2610_v34  }
 0x3a4   : > { %v771_v17 = vpop.permute.xlu1 %770 }
 0x3a5   : > { %v778_v18 = vsub.f32 %v2549_v27, %v771_v17  ;;  %v779_v19 = vsub.f32 %v2551_v28, %v771_v17  ;;  %v1722_v17 = vpack.c.bf16 (!%p1473_p11), %v1066_v9, %v1065_v7 }
 0x3a7   : > { %v782_v20 = vmul.f32 1.442695, %v778_v18  ;;  %v784_v21 = vmul.f32 1.442695, %v779_v19  ;;  %v1067_v18 = vld [vmem:[#allocation15 + $0x50] sm:$0xff] (!%p1473_p11)  ;;  %v1068_v19 = vld [vmem:[#allocation15 + $0x58] sm:$0xff] (!%p1473_p11) }
 0x3a8   : > { %v776_v22 = vpop.permute.xlu1 %775 }
 0x3a9   : > { %1881 = vpow2.f32 %v782_v20  ;;  %v780_v24 = vsub.f32 %v2553_v29, %v776_v22  ;;  %v781_v25 = vsub.f32 %v2555_v30, %v776_v22  ;;  %v766_v29 = vmul.f32 1.442695, %v763_v42  ;;  %v1055_v20 = vld [vmem:[#allocation6] sm:$0xff] (!%p1473_p11)  ;;  %v1056_v22 = vld [vmem:[#allocation6 + $0x8] sm:$0xff] (!%p1473_p11) }
 0x3aa   : > { %1883 = vpow2.f32 %v784_v21  ;;  %v764_v30 = vmul.f32 1.442695, %v762_v23  ;;  %v1726_v21 = vpack.c.bf16 (!%p1473_p11), %v1068_v19, %v1067_v18 }
 0x3ab   : > { %v786_v26 = vmul.f32 1.442695, %v780_v24  ;;  %v788_v31 = vmul.f32 1.442695, %v781_v25 }
 0x3ad   : > { %1885 = vpow2.f32 %v786_v26 }
 0x3ae   : > { %1887 = vpow2.f32 %v788_v31 }
 0x3af   : > { %1889 = vpow2.f32 %v766_v29 }
 0x3b0   : > { %1891 = vpow2.f32 %v764_v30 }
 0x3b3   : > { %v1882_v32 = vpop.eup %1881 }
 0x3b4   : > { %v1884_v33 = vpop.eup %1883 }
 0x3b5   : > { %933 = vmatprep.mubr.f32.mxu0 %v1884_v33  ;;  %v794_v35 = vadd.f32 %v1884_v33, %v1882_v32 }
 0x3b6   : > { %934 = vmatmul.mubr.f32.vlgmr.msra.gmra.mrb[2].mxu0 %v1882_v32 }
 0x3b7   : > { %v1886_v27 = vpop.eup %1885  ;;  %795 = vadd.xlane.f32.xlu0 %v794_v35  ;;  %1733 = vmatpush3.bf16.msra.mxu0 (!%p1473_p11), %v1730_v13 }
 0x3b8   : > { %v1888_v28 = vpop.eup %1887 }
 0x3b9   : > { %1003 = vmatprep.mubr.f32.mxu1 %v1888_v28  ;;  %v797_v36 = vadd.f32 %v1888_v28, %v1886_v27  ;;  %v1890_v37 = vpop.eup %1889 }
 0x3ba   : > { %1004 = vmatmul.mubr.f32.vlgmr.msra.gmra.mrb[2].mxu1 %v1886_v27  ;;  %v1892_v38 = vpop.eup %1891  ;;  %v793_v45 = vmul.f32 %v1890_v37, %v791_v43 }
 0x3bb   : > { %798 = vadd.xlane.f32.xlu1 %v797_v36  ;;  %v792_v40 = vmul.f32 %v1892_v38, %v790_v39  ;;  %1709 = vmatpush3.bf16.msra.mxu1 (!%p1473_p11), %v1706_v63  ;;  %v1478_v36 = vld [vmem:[#allocation17] ss:$0 sm:$0xff] (!%p1473_p11) }
 0x3bc   : > { %1711 = vmatprep.subr.bf16.mxu1 (!%p1473_p11), %v1710_v0  ;;  %1616 = vmatprep.mubr.msk.f32.mxu1 (!%p1473_p11), %vm1069_vm5, %v1055_v20 }
 0x3bf   : > { %1713 = vmatpush3.bf16.msra.mxu1 (!%p1473_p11), %v1710_v0 }
 0x3c0   : > { %1715 = vmatprep.subr.bf16.mxu1 (!%p1473_p11), %v1714_v3 }
 0x3c3   : > { %1717 = vmatpush3.bf16.msra.mxu1 (!%p1473_p11), %v1714_v3 }
 0x3c4   : > { %1719 = vmatprep.subr.bf16.mxu1 (!%p1473_p11), %v1718_v6 }
 0x3c7   : > { %1721 = vmatpush3.bf16.msra.mxu1 (!%p1473_p11), %v1718_v6 }
 0x3c8   : > { %1723 = vmatprep.subr.bf16.mxu1 (!%p1473_p11), %v1722_v17 }
 0x3cb   : > { %1725 = vmatpush3.bf16.msra.mxu1 (!%p1473_p11), %v1722_v17 }
 0x3cc   : > { %1018 = vperm.xlu1 %1879, %v1890_v37   ;;  %1727 = vmatprep.subr.bf16.mxu1 (!%p1473_p11), %v1726_v21 }
 0x3cd   : > { %1013 = vperm.xlu0 %1880, %v1892_v38  }
 0x3cf   : > { %1729 = vmatpush3.bf16.msra.mxu1 (!%p1473_p11), %v1726_v21 }
 0x3d1   : > { %1893 = vset.pattern.permute.xlu0 (!%p1473_p11), %v2219_v59 }
 0x3d2   : > { %1617 = vmatmul.mubr.msk.f32.vlgmr.msra.gmra.mrb[0].mxu1 (!%p1473_p11), %vm1069_vm5, %v1056_v22 }
 0x444   : > { %v796_v41 = vpop.xlane.xlu0 %795 }
 0x445   : > { %v800_v44 = vadd.f32 %v796_v41, %v792_v40 }
 0x447   : > { %803 = vst.msk [vmem:[#allocation4] sm:$0xff] %vm802_vm4, %v800_v44 }
 0x448   : > { %v799_v14 = vpop.xlane.xlu1 %798 }
 0x449   : > { %v801_v34 = vadd.f32 %v799_v14, %v793_v45 }
 0x44b   : > { %804 = vst.msk [vmem:[#allocation4 + $0x8] sm:$0xff] %vm802_vm4, %v801_v34 }
 0x44c   : > { %v1014_v15 = vpop.permute.xlu0 %1013  ;;  %v1019_v49 = vpop.permute.xlu1 %1018 }
 0x44d   : > { %v1021_v46 = vmul.f32 %v1014_v15, %v1009_v12  ;;  %v1022_v53 = vmul.f32 %v1019_v49, %v1010_v48 }
 0x44e   : > { %v1033_v56 = vld [vmem:[#allocation4] sm:$0xff] (!%p1473_p11) }
 0x44f   : > { %1894 = vrcp.f32 (!%p1473_p11), %v1033_v56 }
 0x452   : > { %v1034_v57 = vld [vmem:[#allocation4 + $0x8] sm:$0xff] (!%p1473_p11) }
 0x453   : > { %1896 = vrcp.f32 (!%p1473_p11), %v1034_v57 }
 0x459   : > { %v1895_v8 = vpop.eup (!%p1473_p11), %1894 }
 0x45a   : > { %1041 = vperm.xlu0 (!%p1473_p11), %1893, %v1895_v8  }
 0x45d   : > { %v1897_v16 = vpop.eup (!%p1473_p11), %1896 }
 0x45e   : > { %1046 = vperm.xlu0 (!%p1473_p11), %1893, %v1897_v16  }
 0x489   : > { %v1525_v23 = vpop.f32.mrb[2].mxu0 }
 0x48a   : > { %v1526_v42 = vpop.f32.mrb[3].mxu0 }
 0x48b   : > { %v1527_v47 = vadd.f32 %v1526_v42, %v1525_v23 }
 0x48d   : > { %v1023_v50 = vadd.f32 %v1527_v47, %v1021_v46  ;;  %v1560_v51 = vpop.f32.mrb[2].mxu1  ;;  %1032 = sbr.rel (%p1473_p11) target bundleno = 1615 (0x64f), region = 84 }
 0x48e   : > { %v1561_v52 = vpop.f32.mrb[3].mxu1 }
 0x48f   : > { %1025 = vst.msk [vmem:[#allocation5] sm:$0xff] %vm603_vm3, %v1023_v50  ;;  %v1562_v54 = vadd.f32 %v1561_v52, %v1560_v51 }
 0x491   : > { %v1024_v55 = vadd.f32 %v1562_v54, %v1022_v53 }
 0x493   : > { %1026 = vst.msk [vmem:[#allocation5 + $0x8] sm:$0xff] %vm603_vm3, %v1024_v55 }
 0x496   : > { %v1037_v24 = vld [vmem:[#allocation5] sm:$0xff] }
 0x49a   : > { %v1038_v31 = vld [vmem:[#allocation5 + $0x8] sm:$0xff] }
 0x4a5   : > { %v1618_v35 = vpop.f32.mrb[0].mxu1 }
 0x4a6   : > { %v1142_v27 = vpop.f32.mrb[1].mxu1 }
 0x4d9   : > { %v1042_v25 = vpop.permute.xlu0 %1041 }
 0x4da   : > { %v1049_v26 = vmul.f32 %v1042_v25, %v1037_v24 }
 0x4dc   : > { %1051 = vst.msk [vmem:[#allocation19] sm:$0xff] %vm603_vm3, %v1049_v26  ;;  %1623 = vmatprep.mubr.msk.f32.mxu0 %vm603_vm3, %v1049_v26 }
 0x4dd   : > { %v1047_v32 = vpop.permute.xlu0 %1046 }
 0x4de   : > { %v1050_v33 = vmul.f32 %v1047_v32, %v1038_v31 }
 0x4e0   : > { %1052 = vst.msk [vmem:[#allocation19 + $0x8] sm:$0xff] %vm603_vm3, %v1050_v33  ;;  %1624 = vmatmul.mubr.msk.f32.vlgmr.msra.gmra.mrb[0].mxu0 %vm603_vm3, %v1050_v33 }
 0x5b3   : > { %v1625_v28 = vpop.f32.mrb[0].mxu0 }
 0x5b4   : > { %v1229_v29 = vadd.f32 %v1625_v28, %v1618_v35  ;;  %v1223_v30 = vpop.f32.mrb[1].mxu0 }
 0x5b5   : > { %v1224_v37 = vadd.f32 %v1223_v30, %v1142_v27 }
 0x5b6   : > { %v1240_v38 = vadd.f32 %v1478_v36, %v1229_v29 }
 0x5b7   : > { %v1239_v39 = vadd.f32 %v1478_v36, %v1224_v37 }
 0x5b8   : > { %v1242_v40 = vsub.f32 0.0, %v1240_v38 }
 0x5b9   : > { %v1241_v41 = vsub.f32 0.0, %v1239_v39 }
 0x5ba   : > { %v1245_v43 = vmul.f32 1.442695, %v1242_v40 }
 0x5bb   : > { %v1243_v44 = vmul.f32 1.442695, %v1241_v41 }
 0x5bc   : > { %1898 = vpow2.f32 %v1245_v43 }
 0x5bd   : > { %1900 = vpow2.f32 %v1243_v44 }
 0x5c6   : > { %v1899_v45 = vpop.eup %1898 }
 0x5c7   : > { %v1901_v14 = vpop.eup %1900  ;;  %v1248_v12 = vadd.f32 1.0, %v1899_v45 }
 0x5c8   : > { %v1247_v34 = vadd.f32 1.0, %v1901_v14 }
 0x5ca   : > { %1902 = vrcp.f32 %v1247_v34 }
 0x5cb   : > { %1904 = vrcp.f32 %v1248_v12 }
 0x5d4   : > { %v1903_v15 = vpop.eup %1902 }
 0x5d5   : > { %1253 = vrot.lane.b32.xlu1 %v1903_v15, %s2220_s27  ;;  %v1905_v23 = vpop.eup %1904 }
 0x5d9   : > { %1255 = vrot.lane.b32.xlu1 %v1905_v23, %s2220_s27 }
 0x647   : > { %v1254_v42 = vpop.permute.xlu1 %1253 }
 0x648   : > { %v1259_v46 = vmul.f32 %v1254_v42, %v1239_v39 }
 0x64a   : > { %1262 = vst.msk [vmem:[#allocation18] sm:$0xff] %vm1261_vm6, %v1259_v46 }
 0x64b   : > { %v1256_v47 = vpop.permute.xlu1 %1255 }
 0x64c   : > { %v1260_v48 = vmul.f32 %v1256_v47, %v1240_v38 }
 0x64e   : > { %1263 = vst.msk [vmem:[#allocation18 + $0x8] sm:$0xff] %vm1261_vm6, %v1260_v48 }
 0x64f PF: > { %p1801_p3 = scmp.eq.s32.totalorder %s2299_s11, 1  ;;  %s2221_s21 = smov [#allocation18]  }
 0x650   : > { %s1273_s26 = sshll.u32 %s2221_s21, 4  ;;  %s1274_s26 = int_to_ptr.vmem [resolvable:$true] %s1273_s26 }
 0x651   : > { %s2074_s15 = scalar_lea.vmem %s1274_s26, 256  ;;  %p2081_p8 = scmp.lt.s32.totalorder %s1274_s26, %s1274_s26 }
 0x652   : > { %p2075_p12 = scmp.ne.s32.totalorder %s1274_s26, %s2074_s15  ;;  %p2082_p13 = scmp.lt.s32.totalorder %s2074_s15, %s2074_s15 }
 0x654   : > { %p2076_p5 = pnand %p2075_p12, %p1801_p3  ;;  %p2083_p1 = por %p2082_p13, %p2081_p8 }
 0x656   : > { %p2077_p10 = pneg %p2076_p5 }
 0x658   : > { %p2084_p0 = pnand %p2083_p1, %p2077_p10 }
 0x65a   : > { %2087 = shalt.err (!%p2084_p0)
}
 0x65b   : > { %s2766_s3 = sld [smem:[#allocation34_spill]] }
 0x661   : > { %s2088_s8 = scalar_lea.hbm %s2766_s3, 256 }
 0x662   : > { %p2089_p2 = scmp.ne.s32.totalorder %s2766_s3, %s2088_s8  ;;  %p2094_p7 = scmp.lt.u32.totalorder %s2088_s8, %s2766_s3 }
 0x664   : > { %p2090_p4 = pnand %p2089_p2, %p1801_p3 }
 0x666   : > { %p2091_p6 = pneg %p2090_p4 }
 0x668   : > { %p2096_p9 = pnand %p2094_p7, %p2091_p6 }
 0x66a   : > { %2099 = shalt.err (!%p2096_p9)
}
 0x66b   : > { %s2222_s20 = smov 128   ;;  %s2223_s25 = smov 8  }
 0x66c   : > { %1768 = dma.vmem_to_hbm [thread:$0]  (%p1801_p3), %s1274_s26, 256, %s2766_s3, [#allocation8], %s2222_s20, %s2222_s20, %s2223_s25  }
 0x66d   : > { %s2224_s14 = smov [#allocation19]  }
 0x66e   : > { %s1289_s18 = sshll.u32 %s2224_s14, 4  ;;  %s1290_s18 = int_to_ptr.vmem [resolvable:$true] %s1289_s18 }
 0x66f   : > { %s2100_s19 = scalar_lea.vmem %s1290_s18, 256  ;;  %p2107_p10 = scmp.lt.s32.totalorder %s1290_s18, %s1290_s18 }
 0x670   : > { %p2101_p11 = scmp.ne.s32.totalorder %s1290_s18, %s2100_s19  ;;  %p2108_p8 = scmp.lt.s32.totalorder %s2100_s19, %s2100_s19 }
 0x672   : > { %p2102_p12 = pnand %p2101_p11, %p1801_p3  ;;  %p2109_p13 = por %p2108_p8, %p2107_p10 }
 0x674   : > { %p2103_p5 = pneg %p2102_p12 }
 0x676   : > { %p2110_p1 = pnand %p2109_p13, %p2103_p5 }
 0x678   : > { %2113 = shalt.err (!%p2110_p1)
}
 0x679   : > { %s2767_s21 = sld [smem:[#allocation35_spill]] }
 0x67f   : > { %s2114_s15 = scalar_lea.hbm %s2767_s21, 256 }
 0x680   : > { %p2115_p0 = scmp.ne.s32.totalorder %s2767_s21, %s2114_s15  ;;  %p2120_p6 = scmp.lt.u32.totalorder %s2114_s15, %s2767_s21 }
 0x682   : > { %p2116_p2 = pnand %p2115_p0, %p1801_p3 }
 0x684   : > { %p2117_p4 = pneg %p2116_p2 }
 0x686   : > { %p2122_p7 = pnand %p2120_p6, %p2117_p4 }
 0x688   : > { %2125 = shalt.err (!%p2122_p7)
}
 0x689   : > { %1770 = dma.vmem_to_hbm [thread:$0]  (%p1801_p3), %s1290_s18, 256, %s2767_s21, [#allocation20], %s2222_s20, %s2222_s20, %s2223_s25  }
 0x68a   : > { %2167 = dma.done.wait (%p1801_p3), [#allocation8], 256  }
 0x68b   : > { %2169 = vsyncadd (%p1801_p3), [#allocation8], 4294967040 }
 0x68c   : > { %2171 = dma.done.wait (%p1801_p3), [#allocation20], 256  }
 0x68d   : > { %2173 = vsyncadd (%p1801_p3), [#allocation20], 4294967040 }
 0x68e PF: > { %s27_s10 = sadd.s32 1, %s2196_s10   ;;  %s2768_s22 = sld [smem:[#allocation32_spill]] }
 0x68f   : > { %p24_p9 = scmp.ge.s32.totalorder %s27_s10, 4   ;;  %s2769_s24 = sld [smem:[#allocation31_spill]] }
 0x690   : > { %s2770_s27 = smov %s2180_s28  ;;  %s2771_s28 = smov %s2184_s29 }
 0x691   : > { %s2773_s30 = smov %s2192_s9  ;;  %26 = sbr.rel (!%p24_p9) target bundleno = 13 (0xd), region = 141 }
 0x694   : > { %s2772_s29 = smov %s2768_s22 }
 0x695   : > { %s2774_s9 = smov %s2769_s24 }
 0x698   :  { %1309 = vsyncpa [#allocation7], 1 }
 0x699   :  { %1311 = vsyncpa [#allocation7 + $0x1], 1 }
 0x69a   :  { %1312 = vsyncpa [#allocation10], 1 }
 0x69b   :  { %1314 = vsyncpa [#allocation10 + $0x1], 1 }
 0x69c   :  { %1315 = vsyncpa [#allocation13], 1 }
 0x69d   :  { %1316 = vsyncpa [#allocation16], 1 }
 0x69e   :  { %1317 = vsyncpa [#allocation8], 1 }
 0x69f   :  { %1319 = vsyncpa [#allocation8 + $0x1], 1 }
 0x6a0   :  { %1320 = vsyncpa [#allocation20], 1 }

</bundles_post_ra>
